<compile_context>
chip_gen: v6e
topology: v6e:2x2x1
jax: 0.10.0
libtpu: 0.0.40
codegen_flags: <defaults>
</compile_context>

<pallas_src>
import functools

import jax
import jax.numpy as jnp
from jax.experimental import pallas as pl
from jax.experimental.pallas import tpu as pltpu


# --------------------------------------------------------------------------- #
# Pass 1: attention coefficient q + per-tile BatchNorm partial statistics.     #
# --------------------------------------------------------------------------- #
def _make_pass1_kernel(cin):
    def kernel(g_ref, xp_ref, wg_w_ref, wg_b_ref, wx_w_ref, psi_w_ref, psi_b_ref,
               w_w_ref, w_b_ref, q_ref, sum_ref, sumsq_ref):
        f32 = jnp.float32

        # g = Wg(g) on the (already nearest-resampled) gate pixels: bf16 MXU, f32 acc.
        gW = jnp.dot(g_ref[...], wg_w_ref[...],
                     preferred_element_type=f32) + wg_b_ref[...]

        # down_x = Wx(x): 2x2/stride-2 conv == space-to-depth patch matmul (no bias).
        down_x = jnp.dot(xp_ref[...], wx_w_ref[...], preferred_element_type=f32)

        # q = sigmoid(psi(relu(g + down_x)))
        s = jnp.maximum(gW + down_x, 0.0)
        # psi: width-1 projection done on the VPU (broadcast mul + cross-lane reduce).
        z = jnp.sum(s * psi_w_ref[...], axis=-1, keepdims=True) + psi_b_ref[...]
        q = 0.5 * (jnp.tanh(0.5 * z) + 1.0)      # sigmoid, overflow-safe, EUP tanh
        q_ref[...] = q

        # Per-tile BN partial stats of y = W(resampled * x) + b.
        # Patch layout: lane block k holds sub-pixel (kh, kw) = (k // 2, k % 2);
        # nearest upsample of q by 2x is exactly "same q for all 4 sub-pixels".
        acc1 = jnp.zeros((1, cin), f32)
        acc2 = jnp.zeros((1, cin), f32)
        for k in range(4):
            xk = xp_ref[:, k * cin:(k + 1) * cin]                 # (TM2, Cin) bf16
            rk = (q * xk.astype(f32)).astype(jnp.bfloat16)        # resampled * x
            yk = jnp.dot(rk, w_w_ref[...],
                         preferred_element_type=f32) + w_b_ref[...]
            acc1 = acc1 + jnp.sum(yk, axis=0, keepdims=True)
            acc2 = acc2 + jnp.sum(yk * yk, axis=0, keepdims=True)
        sum_ref[...] = acc1.reshape(1, 1, cin)
        sumsq_ref[...] = acc2.reshape(1, 1, cin)

    return kernel


# --------------------------------------------------------------------------- #
# Pass 2: recompute y = W(q * x) + b per tile and apply the BN affine.         #
# --------------------------------------------------------------------------- #
def _make_pass2_kernel(cin):
    def kernel(q_ref, xp_ref, w_w_ref, w_b_ref, scale_ref, shift_ref, out_ref):
        f32 = jnp.float32
        q = q_ref[...]
        for k in range(4):
            xk = xp_ref[:, k * cin:(k + 1) * cin]
            rk = (q * xk.astype(f32)).astype(jnp.bfloat16)
            yk = jnp.dot(rk, w_w_ref[...],
                         preferred_element_type=f32) + w_b_ref[...]
            out_ref[k, :, :] = yk * scale_ref[...] + shift_ref[...]

    return kernel


# --------------------------------------------------------------------------- #
# Glue: layout transforms, tiny gate gather, parameter setup, pallas_calls.    #
# --------------------------------------------------------------------------- #
def _pick_tile_rows(m2, max_rows):
    """Largest multiple of 8 that divides m2 and is <= max_rows (fallback: m2)."""
    if m2 <= max_rows:
        return m2
    t = (max_rows // 8) * 8
    while t >= 8:
        if m2 % t == 0:
            return t
        t -= 8
    return m2


def _full_spec(arr):
    nd = arr.ndim
    return pl.BlockSpec(arr.shape, lambda j, nd=nd: (0,) * nd)


def init_params(key, in_channels, gate_channels, inter_channels=None):
    if inter_channels is None:
        inter_channels = in_channels // 2
    k = jax.random.split(key, 8)
    normal = lambda kk, shape: 0.02 * jax.random.normal(kk, shape, dtype=jnp.float32)
    unif = lambda kk, shape, fan: jax.random.uniform(
        kk, shape, dtype=jnp.float32, minval=-1.0 / jnp.sqrt(fan), maxval=1.0 / jnp.sqrt(fan))
    return {
        # W: Conv2d(in, in, k=1, bias=True) + BatchNorm2d(in)
        "W_w": normal(k[0], (in_channels, in_channels, 1, 1)),
        "W_b": unif(k[1], (in_channels,), in_channels),
        "bn_gamma": jnp.ones((in_channels,), jnp.float32),
        "bn_beta": jnp.zeros((in_channels,), jnp.float32),
        # Wx: Conv2d(in, inter, k=2, s=2, bias=False)
        "Wx_w": normal(k[2], (inter_channels, in_channels, 2, 2)),
        # Wg: Conv2d(gate, inter, k=1, bias=True)
        "Wg_w": normal(k[3], (inter_channels, gate_channels, 1, 1)),
        "Wg_b": unif(k[4], (inter_channels,), gate_channels),
        # psi: Conv2d(inter, 1, k=1, bias=True)
        "psi_w": normal(k[5], (1, inter_channels, 1, 1)),
        "psi_b": unif(k[6], (1,), inter_channels),
    }


@functools.partial(jax.jit, static_argnames=("max_tile_rows",))
def attention_block_forward(x, g, params, max_tile_rows=512):
    """x: (N, Cin, H, W) skip features; g: (N, Cg, Hg, Wg) gate signal (NCHW)."""
    N, Cin, H, W = x.shape
    _, Cg, Hg, Wg = g.shape
    assert H % 2 == 0 and W % 2 == 0, "2x2/stride-2 conv + 2x nearest assumes even H, W"
    H2, W2 = H // 2, W // 2
    IC = params["Wx_w"].shape[0]
    M, M2 = N * H * W, N * H2 * W2

    f32, bf16 = jnp.float32, jnp.bfloat16
    x = x.astype(f32)
    g = g.astype(f32)

    # --- gate -> down_x grid nearest resize: tiny gather in glue (commutes with 1x1 Wg)
    si = (jnp.arange(H2) * Hg) // H2          # PyTorch mode='nearest': floor(dst*in/out)
    sj = (jnp.arange(W2) * Wg) // W2
    g_near = g[:, :, si, :][:, :, :, sj]                              # (N, Cg, H2, W2)
    g_mat = g_near.transpose(0, 2, 3, 1).reshape(M2, Cg).astype(bf16)

    # --- space-to-depth 2x2 patches of x, lanes ordered (kh, kw, c) ---
    xpatch = (x.reshape(N, Cin, H2, 2, W2, 2)
               .transpose(0, 2, 4, 3, 5, 1)                           # (N,H2,W2,kh,kw,C)
               .reshape(M2, 4 * Cin).astype(bf16))

    # --- conv / BN weights in matmul form (bf16 MXU operands, f32 biases) ---
    wg_w = params["Wg_w"].reshape(IC, Cg).T.astype(bf16)              # (Cg, IC)
    wg_b = params["Wg_b"].reshape(1, IC).astype(f32)
    wx_w = (params["Wx_w"].transpose(0, 2, 3, 1)                      # (IC, kh, kw, c)
            .reshape(IC, 4 * Cin).T.astype(bf16))                     # (4*Cin, IC)
    psi_w = params["psi_w"].reshape(1, IC).astype(f32)
    psi_b = params["psi_b"].reshape(1, 1).astype(f32)
    w_w = params["W_w"].reshape(Cin, Cin).T.astype(bf16)              # (Cin, Cin)
    w_b = params["W_b"].reshape(1, Cin).astype(f32)
    gamma = params["bn_gamma"].reshape(1, Cin).astype(f32)
    beta = params["bn_beta"].reshape(1, Cin).astype(f32)

    tm2 = _pick_tile_rows(M2, max_tile_rows)
    n_tiles = M2 // tm2
    cparams = pltpu.CompilerParams(
        dimension_semantics=("parallel",),            # shards tiles across TCs on v7x
        vmem_limit_bytes=32 * 1024 * 1024)

    # ------------------- pass 1: q + BN partial statistics -------------------
    q, part_sum, part_sumsq = pl.pallas_call(
        _make_pass1_kernel(Cin),
        grid=(n_tiles,),
        in_specs=[
            pl.BlockSpec((tm2, Cg), lambda j: (j, 0)),
            pl.BlockSpec((tm2, 4 * Cin), lambda j: (j, 0)),
            _full_spec(wg_w), _full_spec(wg_b), _full_spec(wx_w),
            _full_spec(psi_w), _full_spec(psi_b),
            _full_spec(w_w), _full_spec(w_b),
        ],
        out_specs=(
            pl.BlockSpec((tm2, 1), lambda j: (j, 0)),
            pl.BlockSpec((1, 1, Cin), lambda j: (j, 0, 0)),
            pl.BlockSpec((1, 1, Cin), lambda j: (j, 0, 0)),
        ),
        out_shape=(
            jax.ShapeDtypeStruct((M2, 1), f32),
            jax.ShapeDtypeStruct((n_tiles, 1, Cin), f32),
            jax.ShapeDtypeStruct((n_tiles, 1, Cin), f32),
        ),
        compiler_params=cparams,
    )(g_mat, xpatch, wg_w, wg_b, wx_w, psi_w, psi_b, w_w, w_b)

    # --- global BatchNorm statistics (biased variance over all N*H*W pixels) ---
    total = jnp.float32(M)
    mean = (jnp.sum(part_sum, axis=(0, 1)) / total).reshape(1, Cin)
    ex2 = (jnp.sum(part_sumsq, axis=(0, 1)) / total).reshape(1, Cin)
    var = jnp.maximum(ex2 - mean * mean, 0.0)
    inv = jax.lax.rsqrt(var + 1e-5)
    scale = gamma * inv
    shift = beta - mean * scale

    # ------------------- pass 2: W(q*x)+b, normalized ------------------------
    y_patch = pl.pallas_call(
        _make_pass2_kernel(Cin),
        grid=(n_tiles,),
        in_specs=[
            pl.BlockSpec((tm2, 1), lambda j: (j, 0)),
            pl.BlockSpec((tm2, 4 * Cin), lambda j: (j, 0)),
            _full_spec(w_w), _full_spec(w_b), _full_spec(scale), _full_spec(shift),
        ],
        out_specs=pl.BlockSpec((4, tm2, Cin), lambda j: (0, j, 0)),
        out_shape=jax.ShapeDtypeStruct((4, M2, Cin), f32),
        compiler_params=cparams,
    )(q, xpatch, w_w, w_b, scale, shift)

    # --- back to NCHW ---
    # y_patch axis 0: k = kh*2 + kw; axis 1: (n, h2, w2) row-major.
    result = (y_patch.reshape(2, 2, N, H2, W2, Cin)
              .transpose(2, 5, 3, 0, 4, 1)                 # (N, C, H2, kh, W2, kw)
              .reshape(N, Cin, H, W))
    resampled = jnp.broadcast_to(
        q.reshape(N, H2, 1, W2, 1), (N, H2, 2, W2, 2)).reshape(N, 1, H, W)
    return result, resampled


if __name__ == "__main__":
    key = jax.random.PRNGKey(0)
    kx, kg, kp = jax.random.split(key, 3)

    # Small shapes consistent with the module: in_channels=8, gate_channels=4,
    # inter_channels = in_channels // 2 = 4; x spatial 16x16, gate spatial 4x4.
    N, Cin, Cg = 2, 8, 4
    H = W = 16
    Hg = Wg = 4

    x = jax.random.normal(kx, (N, Cin, H, W), dtype=jnp.float32)
    g = jax.random.normal(kg, (N, Cg, Hg, Wg), dtype=jnp.float32)
    params = init_params(kp, in_channels=Cin, gate_channels=Cg)

    # max_tile_rows=64 -> M2 = 2*8*8 = 128 down-grid pixels split into 2 tiles,
    # exercising the multi-tile / pipelined path even at this toy size.
    result, resampled = attention_block_forward(x, g, params, max_tile_rows=64)
    jax.block_until_ready((result, resampled))

    assert result.shape == (N, Cin, H, W)
    assert resampled.shape == (N, 1, H, W)
    assert bool(jnp.all(jnp.isfinite(result)))
    assert bool(jnp.all(jnp.isfinite(resampled)))
    print("KERNEL_OK")
</pallas_src>

<mosaic_0001>
module attributes {stable_mosaic.version = 11 : i64} {
  func.func @kernel(%arg0: i32, %arg1: memref<64x4xbf16, #tpu.memory_space<vmem>>, %arg2: memref<64x32xbf16, #tpu.memory_space<vmem>>, %arg3: memref<4x4xbf16, #tpu.memory_space<vmem>>, %arg4: memref<1x4xf32, #tpu.memory_space<vmem>>, %arg5: memref<32x4xbf16, #tpu.memory_space<vmem>>, %arg6: memref<1x4xf32, #tpu.memory_space<vmem>>, %arg7: memref<1x1xf32, #tpu.memory_space<vmem>>, %arg8: memref<8x8xbf16, #tpu.memory_space<vmem>>, %arg9: memref<1x8xf32, #tpu.memory_space<vmem>>, %arg10: memref<64x1xf32, #tpu.memory_space<vmem>>, %arg11: memref<1x1x8xf32, #tpu.memory_space<vmem>>, %arg12: memref<1x1x8xf32, #tpu.memory_space<vmem>>) attributes {dimension_semantics = [#tpu.dimension_semantics<parallel>], iteration_bounds = array<i64: 2>, scalar_prefetch = 0 : i64, scratch_operands = 0 : i64, tpu.core_type = #tpu.core_type<tc>, window_params = [{transform_indices = @transform_0, window_bounds = array<i64: 64, 4>}, {transform_indices = @transform_1, window_bounds = array<i64: 64, 32>}, {pipeline_mode = #tpu.pipeline_mode<synchronous>, transform_indices = @transform_2, window_bounds = array<i64: 4, 4>}, {pipeline_mode = #tpu.pipeline_mode<synchronous>, transform_indices = @transform_3, window_bounds = array<i64: 1, 4>}, {pipeline_mode = #tpu.pipeline_mode<synchronous>, transform_indices = @transform_4, window_bounds = array<i64: 32, 4>}, {pipeline_mode = #tpu.pipeline_mode<synchronous>, transform_indices = @transform_5, window_bounds = array<i64: 1, 4>}, {pipeline_mode = #tpu.pipeline_mode<synchronous>, transform_indices = @transform_6, window_bounds = array<i64: 1, 1>}, {pipeline_mode = #tpu.pipeline_mode<synchronous>, transform_indices = @transform_7, window_bounds = array<i64: 8, 8>}, {pipeline_mode = #tpu.pipeline_mode<synchronous>, transform_indices = @transform_8, window_bounds = array<i64: 1, 8>}, {transform_indices = @transform_9, window_bounds = array<i64: 64, 1>}, {transform_indices = @transform_10, window_bounds = array<i64: 1, 1, 8>}, {transform_indices = @transform_11, window_bounds = array<i64: 1, 1, 8>}]} {
    %c0 = arith.constant 0 : index
    %c0_0 = arith.constant 0 : index
    %0 = vector.load %arg1[%c0, %c0_0] : memref<64x4xbf16, #tpu.memory_space<vmem>>, vector<64x4xbf16>
    %c0_1 = arith.constant 0 : index
    %c0_2 = arith.constant 0 : index
    %1 = vector.load %arg3[%c0_1, %c0_2] : memref<4x4xbf16, #tpu.memory_space<vmem>>, vector<4x4xbf16>
    %cst = arith.constant dense<0.000000e+00> : vector<64x4xf32>
    %2 = tpu.matmul %0, %1, %cst {dimension_numbers = #tpu.dot_dimension_numbers<[1], [0], [0], [1], [0, 0, 1, 1], [], []>} : vector<64x4xbf16>, vector<4x4xbf16>, vector<64x4xf32> -> vector<64x4xf32>
    %c0_3 = arith.constant 0 : index
    %c0_4 = arith.constant 0 : index
    %3 = vector.load %arg4[%c0_3, %c0_4] : memref<1x4xf32, #tpu.memory_space<vmem>>, vector<1x4xf32>
    %4 = vector.broadcast %3 : vector<1x4xf32> to vector<64x4xf32>
    %5 = arith.addf %2, %4 : vector<64x4xf32>
    %c0_5 = arith.constant 0 : index
    %c0_6 = arith.constant 0 : index
    %6 = vector.load %arg2[%c0_5, %c0_6] : memref<64x32xbf16, #tpu.memory_space<vmem>>, vector<64x32xbf16>
    %c0_7 = arith.constant 0 : index
    %c0_8 = arith.constant 0 : index
    %7 = vector.load %arg5[%c0_7, %c0_8] : memref<32x4xbf16, #tpu.memory_space<vmem>>, vector<32x4xbf16>
    %cst_9 = arith.constant dense<0.000000e+00> : vector<64x4xf32>
    %8 = tpu.matmul %6, %7, %cst_9 {dimension_numbers = #tpu.dot_dimension_numbers<[1], [0], [0], [1], [0, 0, 1, 1], [], []>} : vector<64x32xbf16>, vector<32x4xbf16>, vector<64x4xf32> -> vector<64x4xf32>
    %9 = arith.addf %5, %8 : vector<64x4xf32>
    %cst_10 = arith.constant 0.000000e+00 : f32
    %10 = vector.broadcast %cst_10 : f32 to vector<64x4xf32>
    %11 = arith.maximumf %9, %10 : vector<64x4xf32>
    %c0_11 = arith.constant 0 : index
    %c0_12 = arith.constant 0 : index
    %12 = vector.load %arg6[%c0_11, %c0_12] : memref<1x4xf32, #tpu.memory_space<vmem>>, vector<1x4xf32>
    %13 = vector.broadcast %12 : vector<1x4xf32> to vector<64x4xf32>
    %14 = arith.mulf %11, %13 : vector<64x4xf32>
    %cst_13 = arith.constant dense<0.000000e+00> : vector<64xf32>
    %15 = vector.multi_reduction <add>, %14, %cst_13 [1] : vector<64x4xf32> to vector<64xf32>
    %16 = vector.shape_cast %15 : vector<64xf32> to vector<64x1xf32>
    %c0_14 = arith.constant 0 : index
    %c0_15 = arith.constant 0 : index
    %17 = vector.load %arg7[%c0_14, %c0_15] : memref<1x1xf32, #tpu.memory_space<vmem>>, vector<1x1xf32>
    %18 = vector.broadcast %17 : vector<1x1xf32> to vector<64x1xf32>
    %19 = arith.addf %16, %18 : vector<64x1xf32>
    %cst_16 = arith.constant 5.000000e-01 : f32
    %20 = vector.broadcast %cst_16 : f32 to vector<64x1xf32>
    %21 = arith.mulf %20, %19 : vector<64x1xf32>
    %22 = math.tanh %21 : vector<64x1xf32>
    %cst_17 = arith.constant 1.000000e+00 : f32
    %23 = vector.broadcast %cst_17 : f32 to vector<64x1xf32>
    %24 = arith.addf %22, %23 : vector<64x1xf32>
    %cst_18 = arith.constant 5.000000e-01 : f32
    %25 = vector.broadcast %cst_18 : f32 to vector<64x1xf32>
    %26 = arith.mulf %25, %24 : vector<64x1xf32>
    %c0_19 = arith.constant 0 : index
    %c0_20 = arith.constant 0 : index
    %27 = vector.load %arg10[%c0_19, %c0_20] : memref<64x1xf32, #tpu.memory_space<vmem>>, vector<64x1xf32>
    tpu.vector_store %arg10[%c0_19, %c0_20], %26 {strides = array<i32>} : memref<64x1xf32, #tpu.memory_space<vmem>>, vector<64x1xf32>,
    %cst_21 = arith.constant 0.000000e+00 : f32
    %28 = vector.broadcast %cst_21 : f32 to vector<1x8xf32>
    %cst_22 = arith.constant 0.000000e+00 : f32
    %29 = vector.broadcast %cst_22 : f32 to vector<1x8xf32>
    %c0_23 = arith.constant 0 : index
    %c0_24 = arith.constant 0 : index
    %30 = vector.load %arg2[%c0_23, %c0_24] : memref<64x32xbf16, #tpu.memory_space<vmem>>, vector<64x8xbf16>
    %31 = arith.extf %30 : vector<64x8xbf16> to vector<64x8xf32>
    %32 = vector.broadcast %26 : vector<64x1xf32> to vector<64x8xf32>
    %33 = arith.mulf %32, %31 : vector<64x8xf32>
    %34 = arith.truncf %33 : vector<64x8xf32> to vector<64x8xbf16>
    %c0_25 = arith.constant 0 : index
    %c0_26 = arith.constant 0 : index
    %35 = vector.load %arg8[%c0_25, %c0_26] : memref<8x8xbf16, #tpu.memory_space<vmem>>, vector<8x8xbf16>
    %cst_27 = arith.constant dense<0.000000e+00> : vector<64x8xf32>
    %36 = tpu.matmul %34, %35, %cst_27 {dimension_numbers = #tpu.dot_dimension_numbers<[1], [0], [0], [1], [0, 0, 1, 1], [], []>} : vector<64x8xbf16>, vector<8x8xbf16>, vector<64x8xf32> -> vector<64x8xf32>
    %c0_28 = arith.constant 0 : index
    %c0_29 = arith.constant 0 : index
    %37 = vector.load %arg9[%c0_28, %c0_29] : memref<1x8xf32, #tpu.memory_space<vmem>>, vector<1x8xf32>
    %38 = vector.broadcast %37 : vector<1x8xf32> to vector<64x8xf32>
    %39 = arith.addf %36, %38 : vector<64x8xf32>
    %cst_30 = arith.constant dense<0.000000e+00> : vector<8xf32>
    %40 = vector.multi_reduction <add>, %39, %cst_30 [0] : vector<64x8xf32> to vector<8xf32>
    %41 = vector.shape_cast %40 : vector<8xf32> to vector<1x8xf32>
    %42 = arith.addf %28, %41 : vector<1x8xf32>
    %43 = arith.mulf %39, %39 : vector<64x8xf32>
    %cst_31 = arith.constant dense<0.000000e+00> : vector<8xf32>
    %44 = vector.multi_reduction <add>, %43, %cst_31 [0] : vector<64x8xf32> to vector<8xf32>
    %45 = vector.shape_cast %44 : vector<8xf32> to vector<1x8xf32>
    %46 = arith.addf %29, %45 : vector<1x8xf32>
    %c0_32 = arith.constant 0 : index
    %c8 = arith.constant 8 : index
    %47 = vector.load %arg2[%c0_32, %c8] : memref<64x32xbf16, #tpu.memory_space<vmem>>, vector<64x8xbf16>
    %48 = arith.extf %47 : vector<64x8xbf16> to vector<64x8xf32>
    %49 = vector.broadcast %26 : vector<64x1xf32> to vector<64x8xf32>
    %50 = arith.mulf %49, %48 : vector<64x8xf32>
    %51 = arith.truncf %50 : vector<64x8xf32> to vector<64x8xbf16>
    %c0_33 = arith.constant 0 : index
    %c0_34 = arith.constant 0 : index
    %52 = vector.load %arg8[%c0_33, %c0_34] : memref<8x8xbf16, #tpu.memory_space<vmem>>, vector<8x8xbf16>
    %cst_35 = arith.constant dense<0.000000e+00> : vector<64x8xf32>
    %53 = tpu.matmul %51, %52, %cst_35 {dimension_numbers = #tpu.dot_dimension_numbers<[1], [0], [0], [1], [0, 0, 1, 1], [], []>} : vector<64x8xbf16>, vector<8x8xbf16>, vector<64x8xf32> -> vector<64x8xf32>
    %c0_36 = arith.constant 0 : index
    %c0_37 = arith.constant 0 : index
    %54 = vector.load %arg9[%c0_36, %c0_37] : memref<1x8xf32, #tpu.memory_space<vmem>>, vector<1x8xf32>
    %55 = vector.broadcast %54 : vector<1x8xf32> to vector<64x8xf32>
    %56 = arith.addf %53, %55 : vector<64x8xf32>
    %cst_38 = arith.constant dense<0.000000e+00> : vector<8xf32>
    %57 = vector.multi_reduction <add>, %56, %cst_38 [0] : vector<64x8xf32> to vector<8xf32>
    %58 = vector.shape_cast %57 : vector<8xf32> to vector<1x8xf32>
    %59 = arith.addf %42, %58 : vector<1x8xf32>
    %60 = arith.mulf %56, %56 : vector<64x8xf32>
    %cst_39 = arith.constant dense<0.000000e+00> : vector<8xf32>
    %61 = vector.multi_reduction <add>, %60, %cst_39 [0] : vector<64x8xf32> to vector<8xf32>
    %62 = vector.shape_cast %61 : vector<8xf32> to vector<1x8xf32>
    %63 = arith.addf %46, %62 : vector<1x8xf32>
    %c0_40 = arith.constant 0 : index
    %c16 = arith.constant 16 : index
    %64 = vector.load %arg2[%c0_40, %c16] : memref<64x32xbf16, #tpu.memory_space<vmem>>, vector<64x8xbf16>
    %65 = arith.extf %64 : vector<64x8xbf16> to vector<64x8xf32>
    %66 = vector.broadcast %26 : vector<64x1xf32> to vector<64x8xf32>
    %67 = arith.mulf %66, %65 : vector<64x8xf32>
    %68 = arith.truncf %67 : vector<64x8xf32> to vector<64x8xbf16>
    %c0_41 = arith.constant 0 : index
    %c0_42 = arith.constant 0 : index
    %69 = vector.load %arg8[%c0_41, %c0_42] : memref<8x8xbf16, #tpu.memory_space<vmem>>, vector<8x8xbf16>
    %cst_43 = arith.constant dense<0.000000e+00> : vector<64x8xf32>
    %70 = tpu.matmul %68, %69, %cst_43 {dimension_numbers = #tpu.dot_dimension_numbers<[1], [0], [0], [1], [0, 0, 1, 1], [], []>} : vector<64x8xbf16>, vector<8x8xbf16>, vector<64x8xf32> -> vector<64x8xf32>
    %c0_44 = arith.constant 0 : index
    %c0_45 = arith.constant 0 : index
    %71 = vector.load %arg9[%c0_44, %c0_45] : memref<1x8xf32, #tpu.memory_space<vmem>>, vector<1x8xf32>
    %72 = vector.broadcast %71 : vector<1x8xf32> to vector<64x8xf32>
    %73 = arith.addf %70, %72 : vector<64x8xf32>
    %cst_46 = arith.constant dense<0.000000e+00> : vector<8xf32>
    %74 = vector.multi_reduction <add>, %73, %cst_46 [0] : vector<64x8xf32> to vector<8xf32>
    %75 = vector.shape_cast %74 : vector<8xf32> to vector<1x8xf32>
    %76 = arith.addf %59, %75 : vector<1x8xf32>
    %77 = arith.mulf %73, %73 : vector<64x8xf32>
    %cst_47 = arith.constant dense<0.000000e+00> : vector<8xf32>
    %78 = vector.multi_reduction <add>, %77, %cst_47 [0] : vector<64x8xf32> to vector<8xf32>
    %79 = vector.shape_cast %78 : vector<8xf32> to vector<1x8xf32>
    %80 = arith.addf %63, %79 : vector<1x8xf32>
    %c0_48 = arith.constant 0 : index
    %c24 = arith.constant 24 : index
    %81 = vector.load %arg2[%c0_48, %c24] : memref<64x32xbf16, #tpu.memory_space<vmem>>, vector<64x8xbf16>
    %82 = arith.extf %81 : vector<64x8xbf16> to vector<64x8xf32>
    %83 = vector.broadcast %26 : vector<64x1xf32> to vector<64x8xf32>
    %84 = arith.mulf %83, %82 : vector<64x8xf32>
    %85 = arith.truncf %84 : vector<64x8xf32> to vector<64x8xbf16>
    %c0_49 = arith.constant 0 : index
    %c0_50 = arith.constant 0 : index
    %86 = vector.load %arg8[%c0_49, %c0_50] : memref<8x8xbf16, #tpu.memory_space<vmem>>, vector<8x8xbf16>
    %cst_51 = arith.constant dense<0.000000e+00> : vector<64x8xf32>
    %87 = tpu.matmul %85, %86, %cst_51 {dimension_numbers = #tpu.dot_dimension_numbers<[1], [0], [0], [1], [0, 0, 1, 1], [], []>} : vector<64x8xbf16>, vector<8x8xbf16>, vector<64x8xf32> -> vector<64x8xf32>
    %c0_52 = arith.constant 0 : index
    %c0_53 = arith.constant 0 : index
    %88 = vector.load %arg9[%c0_52, %c0_53] : memref<1x8xf32, #tpu.memory_space<vmem>>, vector<1x8xf32>
    %89 = vector.broadcast %88 : vector<1x8xf32> to vector<64x8xf32>
    %90 = arith.addf %87, %89 : vector<64x8xf32>
    %cst_54 = arith.constant dense<0.000000e+00> : vector<8xf32>
    %91 = vector.multi_reduction <add>, %90, %cst_54 [0] : vector<64x8xf32> to vector<8xf32>
    %92 = vector.shape_cast %91 : vector<8xf32> to vector<1x8xf32>
    %93 = arith.addf %76, %92 : vector<1x8xf32>
    %94 = arith.mulf %90, %90 : vector<64x8xf32>
    %cst_55 = arith.constant dense<0.000000e+00> : vector<8xf32>
    %95 = vector.multi_reduction <add>, %94, %cst_55 [0] : vector<64x8xf32> to vector<8xf32>
    %96 = vector.shape_cast %95 : vector<8xf32> to vector<1x8xf32>
    %97 = arith.addf %80, %96 : vector<1x8xf32>
    %98 = vector.shape_cast %93 : vector<1x8xf32> to vector<1x1x8xf32>
    %c0_56 = arith.constant 0 : index
    %c0_57 = arith.constant 0 : index
    %c0_58 = arith.constant 0 : index
    %99 = vector.load %arg11[%c0_56, %c0_57, %c0_58] : memref<1x1x8xf32, #tpu.memory_space<vmem>>, vector<1x1x8xf32>
    tpu.vector_store %arg11[%c0_56, %c0_57, %c0_58], %98 {strides = array<i32>} : memref<1x1x8xf32, #tpu.memory_space<vmem>>, vector<1x1x8xf32>,
    %100 = vector.shape_cast %97 : vector<1x8xf32> to vector<1x1x8xf32>
    %c0_59 = arith.constant 0 : index
    %c0_60 = arith.constant 0 : index
    %c0_61 = arith.constant 0 : index
    %101 = vector.load %arg12[%c0_59, %c0_60, %c0_61] : memref<1x1x8xf32, #tpu.memory_space<vmem>>, vector<1x1x8xf32>
    tpu.vector_store %arg12[%c0_59, %c0_60, %c0_61], %100 {strides = array<i32>} : memref<1x1x8xf32, #tpu.memory_space<vmem>>, vector<1x1x8xf32>,
    return
  }
  func.func @transform_0(%arg0: i32) -> (i32, i32) {
    %c0_i32 = arith.constant 0 : i32
    %c0_i32_0 = arith.constant 0 : i32
    return %arg0, %c0_i32 : i32, i32
  }
  func.func @transform_1(%arg0: i32) -> (i32, i32) {
    %c0_i32 = arith.constant 0 : i32
    %c0_i32_0 = arith.constant 0 : i32
    return %arg0, %c0_i32 : i32, i32
  }
  func.func @transform_2(%arg0: i32) -> (i32, i32) {
    %c0_i32 = arith.constant 0 : i32
    %c0_i32_0 = arith.constant 0 : i32
    %c0_i32_1 = arith.constant 0 : i32
    return %c0_i32, %c0_i32_0 : i32, i32
  }
  func.func @transform_3(%arg0: i32) -> (i32, i32) {
    %c0_i32 = arith.constant 0 : i32
    %c0_i32_0 = arith.constant 0 : i32
    %c0_i32_1 = arith.constant 0 : i32
    return %c0_i32, %c0_i32_0 : i32, i32
  }
  func.func @transform_4(%arg0: i32) -> (i32, i32) {
    %c0_i32 = arith.constant 0 : i32
    %c0_i32_0 = arith.constant 0 : i32
    %c0_i32_1 = arith.constant 0 : i32
    return %c0_i32, %c0_i32_0 : i32, i32
  }
  func.func @transform_5(%arg0: i32) -> (i32, i32) {
    %c0_i32 = arith.constant 0 : i32
    %c0_i32_0 = arith.constant 0 : i32
    %c0_i32_1 = arith.constant 0 : i32
    return %c0_i32, %c0_i32_0 : i32, i32
  }
  func.func @transform_6(%arg0: i32) -> (i32, i32) {
    %c0_i32 = arith.constant 0 : i32
    %c0_i32_0 = arith.constant 0 : i32
    %c0_i32_1 = arith.constant 0 : i32
    return %c0_i32, %c0_i32_0 : i32, i32
  }
  func.func @transform_7(%arg0: i32) -> (i32, i32) {
    %c0_i32 = arith.constant 0 : i32
    %c0_i32_0 = arith.constant 0 : i32
    %c0_i32_1 = arith.constant 0 : i32
    return %c0_i32, %c0_i32_0 : i32, i32
  }
  func.func @transform_8(%arg0: i32) -> (i32, i32) {
    %c0_i32 = arith.constant 0 : i32
    %c0_i32_0 = arith.constant 0 : i32
    %c0_i32_1 = arith.constant 0 : i32
    return %c0_i32, %c0_i32_0 : i32, i32
  }
  func.func @transform_9(%arg0: i32) -> (i32, i32) {
    %c0_i32 = arith.constant 0 : i32
    %c0_i32_0 = arith.constant 0 : i32
    return %arg0, %c0_i32 : i32, i32
  }
  func.func @transform_10(%arg0: i32) -> (i32, i32, i32) {
    %c0_i32 = arith.constant 0 : i32
    %c0_i32_0 = arith.constant 0 : i32
    %c0_i32_1 = arith.constant 0 : i32
    return %arg0, %c0_i32, %c0_i32_0 : i32, i32, i32
  }
  func.func @transform_11(%arg0: i32) -> (i32, i32, i32) {
    %c0_i32 = arith.constant 0 : i32
    %c0_i32_0 = arith.constant 0 : i32
    %c0_i32_1 = arith.constant 0 : i32
    return %arg0, %c0_i32, %c0_i32_0 : i32, i32, i32
  }
}

module attributes {stable_mosaic.version = 11 : i64} {
  func.func @kernel(%arg0: i32, %arg1: memref<64x1xf32, #tpu.memory_space<vmem>>, %arg2: memref<64x32xbf16, #tpu.memory_space<vmem>>, %arg3: memref<8x8xbf16, #tpu.memory_space<vmem>>, %arg4: memref<1x8xf32, #tpu.memory_space<vmem>>, %arg5: memref<1x8xf32, #tpu.memory_space<vmem>>, %arg6: memref<1x8xf32, #tpu.memory_space<vmem>>, %arg7: memref<4x64x8xf32, #tpu.memory_space<vmem>>) attributes {dimension_semantics = [#tpu.dimension_semantics<parallel>], iteration_bounds = array<i64: 2>, scalar_prefetch = 0 : i64, scratch_operands = 0 : i64, tpu.core_type = #tpu.core_type<tc>, window_params = [{transform_indices = @transform_0, window_bounds = array<i64: 64, 1>}, {transform_indices = @transform_1, window_bounds = array<i64: 64, 32>}, {pipeline_mode = #tpu.pipeline_mode<synchronous>, transform_indices = @transform_2, window_bounds = array<i64: 8, 8>}, {pipeline_mode = #tpu.pipeline_mode<synchronous>, transform_indices = @transform_3, window_bounds = array<i64: 1, 8>}, {pipeline_mode = #tpu.pipeline_mode<synchronous>, transform_indices = @transform_4, window_bounds = array<i64: 1, 8>}, {pipeline_mode = #tpu.pipeline_mode<synchronous>, transform_indices = @transform_5, window_bounds = array<i64: 1, 8>}, {transform_indices = @transform_6, window_bounds = array<i64: 4, 64, 8>}]} {
    %c0 = arith.constant 0 : index
    %c0_0 = arith.constant 0 : index
    %0 = vector.load %arg1[%c0, %c0_0] : memref<64x1xf32, #tpu.memory_space<vmem>>, vector<64x1xf32>
    %c0_1 = arith.constant 0 : index
    %c0_2 = arith.constant 0 : index
    %1 = vector.load %arg2[%c0_1, %c0_2] : memref<64x32xbf16, #tpu.memory_space<vmem>>, vector<64x8xbf16>
    %2 = arith.extf %1 : vector<64x8xbf16> to vector<64x8xf32>
    %3 = vector.broadcast %0 : vector<64x1xf32> to vector<64x8xf32>
    %4 = arith.mulf %3, %2 : vector<64x8xf32>
    %5 = arith.truncf %4 : vector<64x8xf32> to vector<64x8xbf16>
    %c0_3 = arith.constant 0 : index
    %c0_4 = arith.constant 0 : index
    %6 = vector.load %arg3[%c0_3, %c0_4] : memref<8x8xbf16, #tpu.memory_space<vmem>>, vector<8x8xbf16>
    %cst = arith.constant dense<0.000000e+00> : vector<64x8xf32>
    %7 = tpu.matmul %5, %6, %cst {dimension_numbers = #tpu.dot_dimension_numbers<[1], [0], [0], [1], [0, 0, 1, 1], [], []>} : vector<64x8xbf16>, vector<8x8xbf16>, vector<64x8xf32> -> vector<64x8xf32>
    %c0_5 = arith.constant 0 : index
    %c0_6 = arith.constant 0 : index
    %8 = vector.load %arg4[%c0_5, %c0_6] : memref<1x8xf32, #tpu.memory_space<vmem>>, vector<1x8xf32>
    %9 = vector.broadcast %8 : vector<1x8xf32> to vector<64x8xf32>
    %10 = arith.addf %7, %9 : vector<64x8xf32>
    %c0_7 = arith.constant 0 : index
    %c0_8 = arith.constant 0 : index
    %11 = vector.load %arg5[%c0_7, %c0_8] : memref<1x8xf32, #tpu.memory_space<vmem>>, vector<1x8xf32>
    %12 = vector.broadcast %11 : vector<1x8xf32> to vector<64x8xf32>
    %13 = arith.mulf %10, %12 : vector<64x8xf32>
    %c0_9 = arith.constant 0 : index
    %c0_10 = arith.constant 0 : index
    %14 = vector.load %arg6[%c0_9, %c0_10] : memref<1x8xf32, #tpu.memory_space<vmem>>, vector<1x8xf32>
    %15 = vector.broadcast %14 : vector<1x8xf32> to vector<64x8xf32>
    %16 = arith.addf %13, %15 : vector<64x8xf32>
    %c0_11 = arith.constant 0 : index
    %c0_12 = arith.constant 0 : index
    %c0_13 = arith.constant 0 : index
    %17 = vector.load %arg7[%c0_11, %c0_12, %c0_13] : memref<4x64x8xf32, #tpu.memory_space<vmem>>, vector<1x64x8xf32>
    %18 = vector.shape_cast %17 : vector<1x64x8xf32> to vector<64x8xf32>
    %19 = vector.shape_cast %16 : vector<64x8xf32> to vector<1x64x8xf32>
    tpu.vector_store %arg7[%c0_11, %c0_12, %c0_13], %19 {strides = array<i32>} : memref<4x64x8xf32, #tpu.memory_space<vmem>>, vector<1x64x8xf32>,
    %c0_14 = arith.constant 0 : index
    %c8 = arith.constant 8 : index
    %20 = vector.load %arg2[%c0_14, %c8] : memref<64x32xbf16, #tpu.memory_space<vmem>>, vector<64x8xbf16>
    %21 = arith.extf %20 : vector<64x8xbf16> to vector<64x8xf32>
    %22 = vector.broadcast %0 : vector<64x1xf32> to vector<64x8xf32>
    %23 = arith.mulf %22, %21 : vector<64x8xf32>
    %24 = arith.truncf %23 : vector<64x8xf32> to vector<64x8xbf16>
    %c0_15 = arith.constant 0 : index
    %c0_16 = arith.constant 0 : index
    %25 = vector.load %arg3[%c0_15, %c0_16] : memref<8x8xbf16, #tpu.memory_space<vmem>>, vector<8x8xbf16>
    %cst_17 = arith.constant dense<0.000000e+00> : vector<64x8xf32>
    %26 = tpu.matmul %24, %25, %cst_17 {dimension_numbers = #tpu.dot_dimension_numbers<[1], [0], [0], [1], [0, 0, 1, 1], [], []>} : vector<64x8xbf16>, vector<8x8xbf16>, vector<64x8xf32> -> vector<64x8xf32>
    %c0_18 = arith.constant 0 : index
    %c0_19 = arith.constant 0 : index
    %27 = vector.load %arg4[%c0_18, %c0_19] : memref<1x8xf32, #tpu.memory_space<vmem>>, vector<1x8xf32>
    %28 = vector.broadcast %27 : vector<1x8xf32> to vector<64x8xf32>
    %29 = arith.addf %26, %28 : vector<64x8xf32>
    %c0_20 = arith.constant 0 : index
    %c0_21 = arith.constant 0 : index
    %30 = vector.load %arg5[%c0_20, %c0_21] : memref<1x8xf32, #tpu.memory_space<vmem>>, vector<1x8xf32>
    %31 = vector.broadcast %30 : vector<1x8xf32> to vector<64x8xf32>
    %32 = arith.mulf %29, %31 : vector<64x8xf32>
    %c0_22 = arith.constant 0 : index
    %c0_23 = arith.constant 0 : index
    %33 = vector.load %arg6[%c0_22, %c0_23] : memref<1x8xf32, #tpu.memory_space<vmem>>, vector<1x8xf32>
    %34 = vector.broadcast %33 : vector<1x8xf32> to vector<64x8xf32>
    %35 = arith.addf %32, %34 : vector<64x8xf32>
    %c1 = arith.constant 1 : index
    %c0_24 = arith.constant 0 : index
    %c0_25 = arith.constant 0 : index
    %36 = vector.load %arg7[%c1, %c0_24, %c0_25] : memref<4x64x8xf32, #tpu.memory_space<vmem>>, vector<1x64x8xf32>
    %37 = vector.shape_cast %36 : vector<1x64x8xf32> to vector<64x8xf32>
    %38 = vector.shape_cast %35 : vector<64x8xf32> to vector<1x64x8xf32>
    tpu.vector_store %arg7[%c1, %c0_24, %c0_25], %38 {strides = array<i32>} : memref<4x64x8xf32, #tpu.memory_space<vmem>>, vector<1x64x8xf32>,
    %c0_26 = arith.constant 0 : index
    %c16 = arith.constant 16 : index
    %39 = vector.load %arg2[%c0_26, %c16] : memref<64x32xbf16, #tpu.memory_space<vmem>>, vector<64x8xbf16>
    %40 = arith.extf %39 : vector<64x8xbf16> to vector<64x8xf32>
    %41 = vector.broadcast %0 : vector<64x1xf32> to vector<64x8xf32>
    %42 = arith.mulf %41, %40 : vector<64x8xf32>
    %43 = arith.truncf %42 : vector<64x8xf32> to vector<64x8xbf16>
    %c0_27 = arith.constant 0 : index
    %c0_28 = arith.constant 0 : index
    %44 = vector.load %arg3[%c0_27, %c0_28] : memref<8x8xbf16, #tpu.memory_space<vmem>>, vector<8x8xbf16>
    %cst_29 = arith.constant dense<0.000000e+00> : vector<64x8xf32>
    %45 = tpu.matmul %43, %44, %cst_29 {dimension_numbers = #tpu.dot_dimension_numbers<[1], [0], [0], [1], [0, 0, 1, 1], [], []>} : vector<64x8xbf16>, vector<8x8xbf16>, vector<64x8xf32> -> vector<64x8xf32>
    %c0_30 = arith.constant 0 : index
    %c0_31 = arith.constant 0 : index
    %46 = vector.load %arg4[%c0_30, %c0_31] : memref<1x8xf32, #tpu.memory_space<vmem>>, vector<1x8xf32>
    %47 = vector.broadcast %46 : vector<1x8xf32> to vector<64x8xf32>
    %48 = arith.addf %45, %47 : vector<64x8xf32>
    %c0_32 = arith.constant 0 : index
    %c0_33 = arith.constant 0 : index
    %49 = vector.load %arg5[%c0_32, %c0_33] : memref<1x8xf32, #tpu.memory_space<vmem>>, vector<1x8xf32>
    %50 = vector.broadcast %49 : vector<1x8xf32> to vector<64x8xf32>
    %51 = arith.mulf %48, %50 : vector<64x8xf32>
    %c0_34 = arith.constant 0 : index
    %c0_35 = arith.constant 0 : index
    %52 = vector.load %arg6[%c0_34, %c0_35] : memref<1x8xf32, #tpu.memory_space<vmem>>, vector<1x8xf32>
    %53 = vector.broadcast %52 : vector<1x8xf32> to vector<64x8xf32>
    %54 = arith.addf %51, %53 : vector<64x8xf32>
    %c2 = arith.constant 2 : index
    %c0_36 = arith.constant 0 : index
    %c0_37 = arith.constant 0 : index
    %55 = vector.load %arg7[%c2, %c0_36, %c0_37] : memref<4x64x8xf32, #tpu.memory_space<vmem>>, vector<1x64x8xf32>
    %56 = vector.shape_cast %55 : vector<1x64x8xf32> to vector<64x8xf32>
    %57 = vector.shape_cast %54 : vector<64x8xf32> to vector<1x64x8xf32>
    tpu.vector_store %arg7[%c2, %c0_36, %c0_37], %57 {strides = array<i32>} : memref<4x64x8xf32, #tpu.memory_space<vmem>>, vector<1x64x8xf32>,
    %c0_38 = arith.constant 0 : index
    %c24 = arith.constant 24 : index
    %58 = vector.load %arg2[%c0_38, %c24] : memref<64x32xbf16, #tpu.memory_space<vmem>>, vector<64x8xbf16>
    %59 = arith.extf %58 : vector<64x8xbf16> to vector<64x8xf32>
    %60 = vector.broadcast %0 : vector<64x1xf32> to vector<64x8xf32>
    %61 = arith.mulf %60, %59 : vector<64x8xf32>
    %62 = arith.truncf %61 : vector<64x8xf32> to vector<64x8xbf16>
    %c0_39 = arith.constant 0 : index
    %c0_40 = arith.constant 0 : index
    %63 = vector.load %arg3[%c0_39, %c0_40] : memref<8x8xbf16, #tpu.memory_space<vmem>>, vector<8x8xbf16>
    %cst_41 = arith.constant dense<0.000000e+00> : vector<64x8xf32>
    %64 = tpu.matmul %62, %63, %cst_41 {dimension_numbers = #tpu.dot_dimension_numbers<[1], [0], [0], [1], [0, 0, 1, 1], [], []>} : vector<64x8xbf16>, vector<8x8xbf16>, vector<64x8xf32> -> vector<64x8xf32>
    %c0_42 = arith.constant 0 : index
    %c0_43 = arith.constant 0 : index
    %65 = vector.load %arg4[%c0_42, %c0_43] : memref<1x8xf32, #tpu.memory_space<vmem>>, vector<1x8xf32>
    %66 = vector.broadcast %65 : vector<1x8xf32> to vector<64x8xf32>
    %67 = arith.addf %64, %66 : vector<64x8xf32>
    %c0_44 = arith.constant 0 : index
    %c0_45 = arith.constant 0 : index
    %68 = vector.load %arg5[%c0_44, %c0_45] : memref<1x8xf32, #tpu.memory_space<vmem>>, vector<1x8xf32>
    %69 = vector.broadcast %68 : vector<1x8xf32> to vector<64x8xf32>
    %70 = arith.mulf %67, %69 : vector<64x8xf32>
    %c0_46 = arith.constant 0 : index
    %c0_47 = arith.constant 0 : index
    %71 = vector.load %arg6[%c0_46, %c0_47] : memref<1x8xf32, #tpu.memory_space<vmem>>, vector<1x8xf32>
    %72 = vector.broadcast %71 : vector<1x8xf32> to vector<64x8xf32>
    %73 = arith.addf %70, %72 : vector<64x8xf32>
    %c3 = arith.constant 3 : index
    %c0_48 = arith.constant 0 : index
    %c0_49 = arith.constant 0 : index
    %74 = vector.load %arg7[%c3, %c0_48, %c0_49] : memref<4x64x8xf32, #tpu.memory_space<vmem>>, vector<1x64x8xf32>
    %75 = vector.shape_cast %74 : vector<1x64x8xf32> to vector<64x8xf32>
    %76 = vector.shape_cast %73 : vector<64x8xf32> to vector<1x64x8xf32>
    tpu.vector_store %arg7[%c3, %c0_48, %c0_49], %76 {strides = array<i32>} : memref<4x64x8xf32, #tpu.memory_space<vmem>>, vector<1x64x8xf32>,
    return
  }
  func.func @transform_0(%arg0: i32) -> (i32, i32) {
    %c0_i32 = arith.constant 0 : i32
    %c0_i32_0 = arith.constant 0 : i32
    return %arg0, %c0_i32 : i32, i32
  }
  func.func @transform_1(%arg0: i32) -> (i32, i32) {
    %c0_i32 = arith.constant 0 : i32
    %c0_i32_0 = arith.constant 0 : i32
    return %arg0, %c0_i32 : i32, i32
  }
  func.func @transform_2(%arg0: i32) -> (i32, i32) {
    %c0_i32 = arith.constant 0 : i32
    %c0_i32_0 = arith.constant 0 : i32
    %c0_i32_1 = arith.constant 0 : i32
    return %c0_i32, %c0_i32_0 : i32, i32
  }
  func.func @transform_3(%arg0: i32) -> (i32, i32) {
    %c0_i32 = arith.constant 0 : i32
    %c0_i32_0 = arith.constant 0 : i32
    %c0_i32_1 = arith.constant 0 : i32
    return %c0_i32, %c0_i32_0 : i32, i32
  }
  func.func @transform_4(%arg0: i32) -> (i32, i32) {
    %c0_i32 = arith.constant 0 : i32
    %c0_i32_0 = arith.constant 0 : i32
    %c0_i32_1 = arith.constant 0 : i32
    return %c0_i32, %c0_i32_0 : i32, i32
  }
  func.func @transform_5(%arg0: i32) -> (i32, i32) {
    %c0_i32 = arith.constant 0 : i32
    %c0_i32_0 = arith.constant 0 : i32
    %c0_i32_1 = arith.constant 0 : i32
    return %c0_i32, %c0_i32_0 : i32, i32
  }
  func.func @transform_6(%arg0: i32) -> (i32, i32, i32) {
    %c0_i32 = arith.constant 0 : i32
    %c0_i32_0 = arith.constant 0 : i32
    %c0_i32_1 = arith.constant 0 : i32
    return %c0_i32, %arg0, %c0_i32_0 : i32, i32, i32
  }
}

</mosaic_0001>

<bundles_post_ra>
// kernel: attention_block_forward.3
= control target key start
LH: loop header
LB: loop body
LE: loop exit
PB: predicated region body
PF: predicated region fallthrough
CT: control target
= control target key end

     0   :  { %s1507_s21 = smov 0   ;;  %s1509_s22 = smov 0   ;;  %s1843_s0 = inlined_call_operand.vmem [shape: f32[128,1], index: 0, kind: input, shape index: {}]   ;;  %s1844_s1 = inlined_call_operand.vmem [shape: bf16[128,32], index: 1, kind: input, shape index: {}]   ;;  %s1845_s2 = inlined_call_operand.vmem [shape: bf16[8,8], index: 2, kind: input, shape index: {}]   ;;  %s1846_s3 = inlined_call_operand.vmem [shape: f32[1,8], index: 3, kind: input, shape index: {}]   ;;  %s1847_s4 = inlined_call_operand.vmem [shape: f32[1,8], index: 4, kind: input, shape index: {}]   ;;  %s1848_s5 = inlined_call_operand.vmem [shape: f32[1,8], index: 5, kind: input, shape index: {}]   ;;  %s1849_s6 = inlined_call_operand.vmem [shape: f32[4,128,8], index: 6, kind: output, shape index: {}]  }
   0x1   :  { %s1511_s23 = smov 0  }
   0x2 LB: > { %s1520_s24 = sadd.s32 4294967295, %s1466_s23   ;;  %s1522_s25 = sadd.s32 1, %s1466_s23   ;;  %s1466_s23 = sphi %s1511_s23, %s1853_s23   ;;  %s1462_s22 = sphi %s1509_s22, %s1852_s22   ;;  %s1458_s21 = sphi %s1507_s21, %s1851_s21  }
   0x3   : > { %s156_s26 = ssub.s32 %s1466_s23, %s1522_s25  ;;  %s159_s27 = sadd.s32 1, %s1462_s22 }
   0x4   : > { %p157_p0 = scmp.eq.s32.totalorder %s156_s26, 0  ;;  %p169_p1 = scmp.ne.s32.totalorder %s1462_s22, %s1458_s21 }
   0x5   : > { %p170_p2 = scmp.eq.s32.totalorder %s1520_s24, 1  ;;  %p1210_p3 = scmp.ge.s32.totalorder %s1466_s23, 1 }
   0x6   : > { %s1530_s28 = scalar_select %p157_p0, %s1462_s22, %s159_s27  }
   0x7   : > { %p1532_p4 = por %p170_p2, %p169_p1  ;;  %p224_p5 = scmp.lt.s32.totalorder %s1466_s23, 3 }
   0x9   : > { %p225_p6 = pnand %p1210_p3, %p224_p5 }
   0xa   : > { %s1212_s30 = sshll.u32 (!%p225_p6), %s1520_s24, 3  ;;  %s1469_s27 = smov (!%p225_p6), 120  }
   0xb   : > { %228 = sbr.rel (%p225_p6) target bundleno = 506 (0x1fa), region = 44  ;;  %p259_p7 = scmp.lt.s32.totalorder (!%p225_p6), %s1212_s30, 15 }
   0xc   : > { %s255_s8 = sand.u32 (!%p225_p6), 1, %s1458_s21  }
   0xd   : > { %s1211_s13 = sshll.u32 (!%p225_p6), %s255_s8, 8 }
   0xe   : > { %s1605_s21 = scalar_lea.vmem (!%p225_p6), [#allocation2], %s1211_s13 }
  0x10   : > { %v1468_v0 = vmov 0   ;;  %s1855_s30 = smov (!%p259_p7, %s1212_s30), 15  ;;  %vm369_vm0 = vcmask 1043456   ;;  %v348_v5 = vld [vmem:[%s1845_s2] sm:$0xf]  ;;  %vm356_vm1 = vcmask 64512  }
  0x11   : > { %1443 = vset.pattern.permute.xlu1 %v1468_v0  ;;  %1442 = vset.pattern.permute.xlu0 %v1468_v0  ;;  %s1213_s7 = sshll.u32 %s1855_s30, 3  ;;  %v371_v6 = vsel %vm369_vm0, %v348_v5, 0  ;;  %v504_v11 = vld [vmem:[%s1845_s2] sm:$0xf]  ;;  %s1215_s15 = sshll.u32 %s1855_s30, 2 }
  0x12   : > { %s262_s10 = scalar_lea.vmem %s1843_s0, %s1213_s7  ;;  %1410 = vmatprep.subr.msk.bf16.mxu0 %vm369_vm0, %v348_v5  ;;  %1411 = vmatprep.subr.msk.bf16.mxu1 %vm369_vm0, %v504_v11  ;;  %v537_v12 = vsel %vm369_vm0, %v504_v11, 0  ;;  %s268_s18 = scalar_lea.vmem %s1844_s1, %s1215_s15  ;;  %v671_v13 = vld [vmem:[%s1845_s2] sm:$0xf] }
  0x13   : > { %v274_v1 = vld [vmem:[%s262_s10 + $0x10] sm:$0xff]  ;;  %v272_v2 = vld [vmem:[%s262_s10] sm:$0xff]  ;;  %v275_v3 = vld [vmem:[%s262_s10 + $0x18] sm:$0xff]  ;;  %1371 = vmatpush3.bf16.msra.mxu0 %v371_v6  ;;  %1381 = vmatpush3.bf16.msra.mxu1 %v537_v12  ;;  %v704_v41 = vsel %vm369_vm0, %v671_v13, 0  ;;  %s1470_s30 = smov 112   ;;  %s1471_s7 = smov 104  }
  0x14   : > { %308 = vperm.xlu1 %1443, %v274_v1   ;;  %298 = vperm.xlu0 %1442, %v272_v2   ;;  %v273_v4 = vld [vmem:[%s262_s10 + $0x8] sm:$0xff]  ;;  %v276_v8 = vld [vmem:[%s262_s10 + $0x20] sm:$0xff]  ;;  %v279_v9 = vld [vmem:[%s262_s10 + $0x38] sm:$0xff]  ;;  %s1273_s16 = sshll.u32 (%p1532_p4), %s1520_s24, 6 }
  0x15   : > { %v277_v7 = vld [vmem:[%s262_s10 + $0x28] sm:$0xff]  ;;  %v278_v10 = vld [vmem:[%s262_s10 + $0x30] sm:$0xff]  ;;  %v838_v14 = vld [vmem:[%s1845_s2] sm:$0xf]  ;;  %1412 = vmatprep.subr.msk.bf16.mxu0 %vm369_vm0, %v671_v13  ;;  %s1770_s19 = scalar_lea.vmem (%p1532_p4), %s1849_s6, %s1273_s16 }
  0x16   : > { %1413 = vmatprep.subr.msk.bf16.mxu1 %vm369_vm0, %v838_v14  ;;  %v1338_v15 = vld [vmem:[%s268_s18 + $0x8] sm:$0xff]   ;;  %v1291_v16 = vld [vmem:[%s268_s18] sm:$0xff]   ;;  %v1339_v23 = vld [vmem:[%s268_s18 + $0x10] sm:$0xff]   ;;  %v871_v50 = vsel %vm369_vm0, %v838_v14, 0 }
  0x17   : > { %v1280_v19 = vunpack.c.l.bf16 %v1338_v15  ;;  %v1292_v20 = vunpack.c.l.bf16 %v1291_v16  ;;  %v1281_v21 = vunpack.c.h.bf16 %v1338_v15  ;;  %v1293_v22 = vunpack.c.h.bf16 %v1291_v16  ;;  %v1340_v32 = vld [vmem:[%s268_s18 + $0x18] sm:$0xff]   ;;  %v1587_v61 = vld [vmem:[%s1846_s3] ss:$0 sm:$0xff] }
  0x18   : > { %313 = vperm.xlu1 %1443, %v275_v3   ;;  %303 = vperm.xlu0 %1442, %v273_v4   ;;  %v1285_v26 = vunpack.c.h.bf16 %v1339_v23  ;;  %v1284_v27 = vunpack.c.l.bf16 %v1339_v23  ;;  %v1289_v37 = vunpack.c.h.bf16 %v1340_v32  ;;  %v1288_v40 = vunpack.c.l.bf16 %v1340_v32  ;;  %v1592_v63 = vld [vmem:[%s1847_s4] ss:$0 sm:$0xff] }
  0x19   : > { %v1598_v1 = vld [vmem:[%s1848_s5] ss:$0 sm:$0xff] }
  0x1c   : > { %323 = vperm.xlu1 %1443, %v277_v7   ;;  %318 = vperm.xlu0 %1442, %v276_v8  }
  0x20   : > { %333 = vperm.xlu1 %1443, %v279_v9   ;;  %328 = vperm.xlu0 %1442, %v278_v10  }
  0x8f   : > { %v309_v17 = vpop.permute.xlu1 %308  ;;  %v299_v18 = vpop.permute.xlu0 %298 }
  0x90   : > { %v338_v28 = vmul.f32 %v1280_v19, %v309_v17  ;;  %v492_v29 = vmul.f32 %v1292_v20, %v299_v18 }
  0x93   : > { %v314_v24 = vpop.permute.xlu1 %313  ;;  %v304_v25 = vpop.permute.xlu0 %303 }
  0x94   : > { %v339_v30 = vmul.f32 %v1281_v21, %v314_v24  ;;  %v493_v31 = vmul.f32 %v1293_v22, %v304_v25 }
  0x96   : > { %v501_v33 = vpack.c.bf16 %v339_v30, %v338_v28  ;;  %v500_v34 = vpack.c.bf16 %v493_v31, %v492_v29 }
  0x97   : > { %v324_v35 = vpop.permute.xlu1 %323  ;;  %v319_v36 = vpop.permute.xlu0 %318 }
  0x98   : > { %v341_v38 = vmul.f32 %v1285_v26, %v324_v35  ;;  %v340_v39 = vmul.f32 %v1284_v27, %v319_v36  ;;  %518 = vrot.lane.b32.xlu1 %v501_v33, %s1469_s27  ;;  %516 = vrot.lane.b32.xlu0 %v500_v34, %s1469_s27 }
  0x99   : > { %1372 = vmatprep.mubr.msk.bf16.mxu0 %vm356_vm1, %v500_v34 }
  0x9a   : > { %1373 = vmatmul.mubr.msk.bf16.vlgmr.msra.gmra.mxu0 %vm356_vm1, %v501_v33  ;;  %v502_v42 = vpack.c.bf16 %v341_v38, %v340_v39 }
  0x9b   : > { %v334_v43 = vpop.permute.xlu1 %333  ;;  %v329_v44 = vpop.permute.xlu0 %328  ;;  %1391 = vmatpush3.bf16.msra.mxu0 %v704_v41 }
  0x9c   : > { %v343_v45 = vmul.f32 %v1289_v37, %v334_v43  ;;  %v342_v46 = vmul.f32 %v1288_v40, %v329_v44  ;;  %520 = vrot.lane.b32.xlu0 %v502_v42, %s1469_s27  ;;  %1376 = vmatprep.mubr.msk.bf16.mxu0 %vm356_vm1, %v502_v42 }
  0x9e   : > { %v503_v47 = vpack.c.bf16 %v343_v45, %v342_v46 }
  0xa0   : > { %683 = vrot.lane.b32.xlu0 %v500_v34, %s1470_s30  ;;  %522 = vrot.lane.b32.xlu1 %v503_v47, %s1469_s27 }
  0xa2   : > { %1377 = vmatmul.mubr.msk.bf16.gmra.mxu0 %vm356_vm1, %v503_v47 }
  0xa4   : > { %685 = vrot.lane.b32.xlu0 %v501_v33, %s1470_s30  ;;  %850 = vrot.lane.b32.xlu1 %v500_v34, %s1471_s7 }
  0xa8   : > { %687 = vrot.lane.b32.xlu0 %v502_v42, %s1470_s30  ;;  %852 = vrot.lane.b32.xlu1 %v501_v33, %s1471_s7 }
  0xac   : > { %689 = vrot.lane.b32.xlu0 %v503_v47, %s1470_s30  ;;  %854 = vrot.lane.b32.xlu1 %v502_v42, %s1471_s7 }
  0xb0   : > { %856 = vrot.lane.b32.xlu1 %v503_v47, %s1471_s7 }
 0x10a   : > { %v519_v48 = vpop.permute.xlu1 %518  ;;  %v517_v49 = vpop.permute.xlu0 %516 }
 0x10b   : > { %1382 = vmatprep.mubr.msk.bf16.mxu1 %vm356_vm1, %v517_v49 }
 0x10c   : > { %1383 = vmatmul.mubr.msk.bf16.vlgmr.msra.gmra.mxu1 %vm356_vm1, %v519_v48 }
 0x10d   : > { %1401 = vmatpush3.bf16.msra.mxu1 %v871_v50 }
 0x10e   : > { %v521_v51 = vpop.permute.xlu0 %520 }
 0x10f   : > { %1386 = vmatprep.mubr.msk.bf16.mxu1 %vm356_vm1, %v521_v51 }
 0x112   : > { %v523_v52 = vpop.permute.xlu1 %522  ;;  %v684_v53 = vpop.permute.xlu0 %683 }
 0x113   : > { %1392 = vmatprep.mubr.msk.bf16.mxu0 %vm356_vm1, %v684_v53 }
 0x114   : > { %1387 = vmatmul.mubr.msk.bf16.gmra.mxu1 %vm356_vm1, %v523_v52 }
 0x116   : > { %v851_v54 = vpop.permute.xlu1 %850  ;;  %v686_v55 = vpop.permute.xlu0 %685 }
 0x117   : > { %1393 = vmatmul.mubr.msk.bf16.vlgmr.msra.gmra.mxu0 %vm356_vm1, %v686_v55  ;;  %1402 = vmatprep.mubr.msk.bf16.mxu1 %vm356_vm1, %v851_v54 }
 0x11a   : > { %v853_v56 = vpop.permute.xlu1 %852  ;;  %v688_v57 = vpop.permute.xlu0 %687 }
 0x11b   : > { %1396 = vmatprep.mubr.msk.bf16.mxu0 %vm356_vm1, %v688_v57 }
 0x11c   : > { %1403 = vmatmul.mubr.msk.bf16.vlgmr.msra.gmra.mxu1 %vm356_vm1, %v853_v56 }
 0x11e   : > { %v855_v58 = vpop.permute.xlu1 %854  ;;  %v690_v59 = vpop.permute.xlu0 %689 }
 0x11f   : > { %1397 = vmatmul.mubr.msk.bf16.gmra.mxu0 %vm356_vm1, %v690_v59  ;;  %1406 = vmatprep.mubr.msk.bf16.mxu1 %vm356_vm1, %v855_v58 }
 0x122   : > { %v857_v60 = vpop.permute.xlu1 %856 }
 0x124   : > { %1407 = vmatmul.mubr.msk.bf16.gmra.mxu1 %vm356_vm1, %v857_v60 }
 0x15a   : > { %v1374_v62 = vpop.f32.mrf.mxu0 }
 0x15b   : > { %v416_v0 = vadd.f32 %v1374_v62, %v1587_v61 }
 0x15c   : > { %v407_v2 = vpop.f32.mrf.mxu0 }
 0x15d   : > { %v447_v3 = vmul.f32 %v1592_v63, %v416_v0  ;;  %v408_v4 = vadd.f32 %v1587_v61, %v407_v2 }
 0x15e   : > { %v1375_v5 = vpop.f32.mrf.mxu0 }
 0x15f   : > { %v462_v6 = vadd.f32 %v1598_v1, %v447_v3  ;;  %v445_v7 = vmul.f32 %v1592_v63, %v408_v4  ;;  %v419_v8 = vadd.f32 %v1375_v5, %v1587_v61 }
 0x160   : > { %v410_v9 = vpop.f32.mrf.mxu0 }
 0x161   : > { %470 = vst.msk [vmem:[%s1605_s21 + $0x10] sm:$0xff] %vm356_vm1, %v462_v6  ;;  %v460_v10 = vadd.f32 %v1598_v1, %v445_v7  ;;  %v448_v11 = vmul.f32 %v1592_v63, %v419_v8  ;;  %v411_v12 = vadd.f32 %v1587_v61, %v410_v9 }
 0x162   : > { %v1378_v13 = vpop.f32.mrf.mxu0 }
 0x163   : > { %468 = vst.msk [vmem:[%s1605_s21] sm:$0xff] %vm356_vm1, %v460_v10  ;;  %v463_v14 = vadd.f32 %v1598_v1, %v448_v11  ;;  %v446_v15 = vmul.f32 %v1592_v63, %v411_v12  ;;  %v432_v16 = vadd.f32 %v1378_v13, %v1587_v61 }
 0x164   : > { %v423_v17 = vpop.f32.mrf.mxu0 }
 0x165   : > { %471 = vst.msk [vmem:[%s1605_s21 + $0x18] sm:$0xff] %vm356_vm1, %v463_v14  ;;  %v461_v18 = vadd.f32 %v1598_v1, %v446_v15  ;;  %v451_v19 = vmul.f32 %v1592_v63, %v432_v16  ;;  %v424_v20 = vadd.f32 %v1587_v61, %v423_v17 }
 0x166   : > { %v1379_v21 = vpop.f32.mrf.mxu0 }
 0x167   : > { %469 = vst.msk [vmem:[%s1605_s21 + $0x8] sm:$0xff] %vm356_vm1, %v461_v18  ;;  %v466_v22 = vadd.f32 %v1598_v1, %v451_v19  ;;  %v449_v23 = vmul.f32 %v1592_v63, %v424_v20  ;;  %v435_v24 = vadd.f32 %v1379_v21, %v1587_v61 }
 0x168   : > { %v426_v25 = vpop.f32.mrf.mxu0 }
 0x169   : > { %474 = vst.msk [vmem:[%s1605_s21 + $0x30] sm:$0xff] %vm356_vm1, %v466_v22  ;;  %v464_v26 = vadd.f32 %v1598_v1, %v449_v23  ;;  %v452_v27 = vmul.f32 %v1592_v63, %v435_v24  ;;  %v427_v28 = vadd.f32 %v1587_v61, %v426_v25 }
 0x16b   : > { %472 = vst.msk [vmem:[%s1605_s21 + $0x20] sm:$0xff] %vm356_vm1, %v464_v26  ;;  %v467_v29 = vadd.f32 %v1598_v1, %v452_v27  ;;  %v450_v30 = vmul.f32 %v1592_v63, %v427_v28 }
 0x16d   : > { %475 = vst.msk [vmem:[%s1605_s21 + $0x38] sm:$0xff] %vm356_vm1, %v467_v29  ;;  %v465_v31 = vadd.f32 %v1598_v1, %v450_v30 }
 0x16f   : > { %473 = vst.msk [vmem:[%s1605_s21 + $0x28] sm:$0xff] %vm356_vm1, %v465_v31 }
 0x1cc   : > { %v1384_v32 = vpop.f32.mrf.mxu1 }
 0x1cd   : > { %v582_v33 = vadd.f32 %v1384_v32, %v1587_v61 }
 0x1ce   : > { %v573_v34 = vpop.f32.mrf.mxu1 }
 0x1cf   : > { %v613_v35 = vmul.f32 %v1592_v63, %v582_v33  ;;  %v574_v36 = vadd.f32 %v1587_v61, %v573_v34 }
 0x1d0   : > { %v1385_v37 = vpop.f32.mrf.mxu1 }
 0x1d1   : > { %v628_v38 = vadd.f32 %v1598_v1, %v613_v35  ;;  %v611_v39 = vmul.f32 %v1592_v63, %v574_v36  ;;  %v585_v40 = vadd.f32 %v1385_v37, %v1587_v61 }
 0x1d2   : > { %v576_v41 = vpop.f32.mrf.mxu1 }
 0x1d3   : > { %1232 = vst.msk [vmem:[%s1605_s21 + $0x50] sm:$0xff] %vm356_vm1, %v628_v38  ;;  %v626_v42 = vadd.f32 %v1598_v1, %v611_v39  ;;  %v614_v43 = vmul.f32 %v1592_v63, %v585_v40  ;;  %v577_v44 = vadd.f32 %v1587_v61, %v576_v41 }
 0x1d4   : > { %v1388_v45 = vpop.f32.mrf.mxu1 }
 0x1d5   : > { %1230 = vst.msk [vmem:[%s1605_s21 + $0x40] sm:$0xff] %vm356_vm1, %v626_v42  ;;  %v629_v46 = vadd.f32 %v1598_v1, %v614_v43  ;;  %v612_v47 = vmul.f32 %v1592_v63, %v577_v44  ;;  %v598_v48 = vadd.f32 %v1388_v45, %v1587_v61 }
 0x1d6   : > { %v589_v49 = vpop.f32.mrf.mxu1 }
 0x1d7   : > { %1233 = vst.msk [vmem:[%s1605_s21 + $0x58] sm:$0xff] %vm356_vm1, %v629_v46  ;;  %v627_v50 = vadd.f32 %v1598_v1, %v612_v47  ;;  %v617_v51 = vmul.f32 %v1592_v63, %v598_v48  ;;  %v590_v52 = vadd.f32 %v1587_v61, %v589_v49  ;;  %v1394_v53 = vpop.f32.mrf.mxu0 }
 0x1d8   : > { %v749_v54 = vadd.f32 %v1394_v53, %v1587_v61  ;;  %v1389_v55 = vpop.f32.mrf.mxu1 }
 0x1d9   : > { %1231 = vst.msk [vmem:[%s1605_s21 + $0x48] sm:$0xff] %vm356_vm1, %v627_v50  ;;  %v632_v56 = vadd.f32 %v1598_v1, %v617_v51  ;;  %v615_v57 = vmul.f32 %v1592_v63, %v590_v52  ;;  %v601_v58 = vadd.f32 %v1389_v55, %v1587_v61  ;;  %v740_v59 = vpop.f32.mrf.mxu0 }
 0x1da   : > { %v780_v60 = vmul.f32 %v1592_v63, %v749_v54  ;;  %v741_v62 = vadd.f32 %v1587_v61, %v740_v59  ;;  %v592_v0 = vpop.f32.mrf.mxu1 }
 0x1db   : > { %1236 = vst.msk [vmem:[%s1605_s21 + $0x70] sm:$0xff] %vm356_vm1, %v632_v56  ;;  %v630_v2 = vadd.f32 %v1598_v1, %v615_v57  ;;  %v618_v3 = vmul.f32 %v1592_v63, %v601_v58  ;;  %v593_v4 = vadd.f32 %v1587_v61, %v592_v0  ;;  %v1395_v5 = vpop.f32.mrf.mxu0 }
 0x1dc   : > { %v795_v6 = vadd.f32 %v1598_v1, %v780_v60  ;;  %v778_v7 = vmul.f32 %v1592_v63, %v741_v62  ;;  %v752_v8 = vadd.f32 %v1395_v5, %v1587_v61  ;;  %v1404_v9 = vpop.f32.mrf.mxu1 }
 0x1dd   : > { %1234 = vst.msk [vmem:[%s1605_s21 + $0x60] sm:$0xff] %vm356_vm1, %v630_v2  ;;  %v633_v10 = vadd.f32 %v1598_v1, %v618_v3  ;;  %v616_v11 = vmul.f32 %v1592_v63, %v593_v4  ;;  %v916_v12 = vadd.f32 %v1404_v9, %v1587_v61  ;;  %v743_v13 = vpop.f32.mrf.mxu0  ;;  %v1089_v9 = vld [vmem:[%s1605_s21 + $0x30] sm:$0xff] (%p1532_p4) }
 0x1de   : > { %1247 = vst.msk [vmem:[%s1605_s21 + $0x90] sm:$0xff] %vm356_vm1, %v795_v6  ;;  %v793_v14 = vadd.f32 %v1598_v1, %v778_v7  ;;  %v781_v15 = vmul.f32 %v1592_v63, %v752_v8  ;;  %v744_v16 = vadd.f32 %v1587_v61, %v743_v13  ;;  %v907_v17 = vpop.f32.mrf.mxu1  ;;  %v1081_v6 = vld [vmem:[%s1605_s21 + $0x10] sm:$0xff] (%p1532_p4)  ;;  %v1085_v7 = vld [vmem:[%s1605_s21 + $0x20] sm:$0xff] (%p1532_p4)  ;;  %v1087_v8 = vld [vmem:[%s1605_s21 + $0x28] sm:$0xff] (%p1532_p4) }
 0x1df   : > { %1237 = vst.msk [vmem:[%s1605_s21 + $0x78] sm:$0xff] %vm356_vm1, %v633_v10  ;;  %v631_v18 = vadd.f32 %v1598_v1, %v616_v11  ;;  %v947_v19 = vmul.f32 %v1592_v63, %v916_v12  ;;  %v908_v20 = vadd.f32 %v1587_v61, %v907_v17  ;;  %v1398_v21 = vpop.f32.mrf.mxu0  ;;  %1082 = vst [vmem:[%s1770_s19 + $0x10] sm:$0xff] (%p1532_p4), %v1081_v6  ;;  %v1091_v10 = vld [vmem:[%s1605_s21 + $0x38] sm:$0xff] (%p1532_p4)  ;;  %v1093_v11 = vld [vmem:[%s1605_s21 + $0x40] sm:$0xff] (%p1532_p4) }
 0x1e0   : > { %1245 = vst.msk [vmem:[%s1605_s21 + $0x80] sm:$0xff] %vm356_vm1, %v793_v14  ;;  %v796_v22 = vadd.f32 %v1598_v1, %v781_v15  ;;  %v779_v23 = vmul.f32 %v1592_v63, %v744_v16  ;;  %v765_v24 = vadd.f32 %v1398_v21, %v1587_v61  ;;  %v1405_v25 = vpop.f32.mrf.mxu1  ;;  %1086 = vst [vmem:[%s1770_s19 + $0x20] sm:$0xff] (%p1532_p4), %v1085_v7  ;;  %v1095_v12 = vld [vmem:[%s1605_s21 + $0x48] sm:$0xff] (%p1532_p4)  ;;  %v1097_v13 = vld [vmem:[%s1605_s21 + $0x50] sm:$0xff] (%p1532_p4) }
 0x1e1   : > { %1235 = vst.msk [vmem:[%s1605_s21 + $0x68] sm:$0xff] %vm356_vm1, %v631_v18  ;;  %v962_v26 = vadd.f32 %v1598_v1, %v947_v19  ;;  %v945_v27 = vmul.f32 %v1592_v63, %v908_v20  ;;  %v919_v28 = vadd.f32 %v1405_v25, %v1587_v61  ;;  %v756_v29 = vpop.f32.mrf.mxu0  ;;  %1088 = vst [vmem:[%s1770_s19 + $0x28] sm:$0xff] (%p1532_p4), %v1087_v8  ;;  %v1099_v14 = vld [vmem:[%s1605_s21 + $0x58] sm:$0xff] (%p1532_p4) }
 0x1e2   : > { %1248 = vst.msk [vmem:[%s1605_s21 + $0x98] sm:$0xff] %vm356_vm1, %v796_v22  ;;  %v794_v30 = vadd.f32 %v1598_v1, %v779_v23  ;;  %v784_v31 = vmul.f32 %v1592_v63, %v765_v24  ;;  %v757_v32 = vadd.f32 %v1587_v61, %v756_v29  ;;  %v910_v33 = vpop.f32.mrf.mxu1  ;;  %1090 = vst [vmem:[%s1770_s19 + $0x30] sm:$0xff] (%p1532_p4), %v1089_v9  ;;  %v1105_v17 = vld [vmem:[%s1605_s21 + $0x70] sm:$0xff] (%p1532_p4) }
 0x1e3   : > { %1262 = vst.msk [vmem:[%s1605_s21 + $0xd0] sm:$0xff] %vm356_vm1, %v962_v26  ;;  %v960_v34 = vadd.f32 %v1598_v1, %v945_v27  ;;  %v948_v35 = vmul.f32 %v1592_v63, %v919_v28  ;;  %v911_v36 = vadd.f32 %v1587_v61, %v910_v33  ;;  %v1399_v37 = vpop.f32.mrf.mxu0  ;;  %1092 = vst [vmem:[%s1770_s19 + $0x38] sm:$0xff] (%p1532_p4), %v1091_v10 }
 0x1e4   : > { %1246 = vst.msk [vmem:[%s1605_s21 + $0x88] sm:$0xff] %vm356_vm1, %v794_v30  ;;  %v799_v38 = vadd.f32 %v1598_v1, %v784_v31  ;;  %v782_v39 = vmul.f32 %v1592_v63, %v757_v32  ;;  %v768_v40 = vadd.f32 %v1399_v37, %v1587_v61  ;;  %v1408_v41 = vpop.f32.mrf.mxu1  ;;  %1094 = vst [vmem:[%s1770_s19 + $0x80] sm:$0xff] (%p1532_p4), %v1093_v11  ;;  %v1101_v15 = vld [vmem:[%s1605_s21 + $0x60] sm:$0xff] (%p1532_p4) }
 0x1e5   : > { %1260 = vst.msk [vmem:[%s1605_s21 + $0xc0] sm:$0xff] %vm356_vm1, %v960_v34  ;;  %v963_v42 = vadd.f32 %v1598_v1, %v948_v35  ;;  %v946_v43 = vmul.f32 %v1592_v63, %v911_v36  ;;  %v932_v44 = vadd.f32 %v1408_v41, %v1587_v61  ;;  %v759_v45 = vpop.f32.mrf.mxu0  ;;  %1096 = vst [vmem:[%s1770_s19 + $0x88] sm:$0xff] (%p1532_p4), %v1095_v12  ;;  %v1113_v21 = vld [vmem:[%s1605_s21 + $0x90] sm:$0xff] (%p1532_p4) }
 0x1e6   : > { %1251 = vst.msk [vmem:[%s1605_s21 + $0xb0] sm:$0xff] %vm356_vm1, %v799_v38  ;;  %v797_v46 = vadd.f32 %v1598_v1, %v782_v39  ;;  %v785_v47 = vmul.f32 %v1592_v63, %v768_v40  ;;  %v760_v48 = vadd.f32 %v1587_v61, %v759_v45  ;;  %v923_v49 = vpop.f32.mrf.mxu1  ;;  %1098 = vst [vmem:[%s1770_s19 + $0x90] sm:$0xff] (%p1532_p4), %v1097_v13  ;;  %v1107_v18 = vld [vmem:[%s1605_s21 + $0x78] sm:$0xff] (%p1532_p4) }
 0x1e7   : > { %1263 = vst.msk [vmem:[%s1605_s21 + $0xd8] sm:$0xff] %vm356_vm1, %v963_v42  ;;  %v961_v50 = vadd.f32 %v1598_v1, %v946_v43  ;;  %v951_v51 = vmul.f32 %v1592_v63, %v932_v44  ;;  %v924_v52 = vadd.f32 %v1587_v61, %v923_v49  ;;  %1100 = vst [vmem:[%s1770_s19 + $0x98] sm:$0xff] (%p1532_p4), %v1099_v14  ;;  %v1109_v19 = vld [vmem:[%s1605_s21 + $0x80] sm:$0xff] (%p1532_p4) }
 0x1e8   : > { %1249 = vst.msk [vmem:[%s1605_s21 + $0xa0] sm:$0xff] %vm356_vm1, %v797_v46  ;;  %v800_v53 = vadd.f32 %v1598_v1, %v785_v47  ;;  %v783_v54 = vmul.f32 %v1592_v63, %v760_v48  ;;  %v1409_v55 = vpop.f32.mrf.mxu1  ;;  %v1103_v16 = vld [vmem:[%s1605_s21 + $0x68] sm:$0xff] (%p1532_p4)  ;;  %1102 = vst [vmem:[%s1770_s19 + $0xa0] sm:$0xff] (%p1532_p4), %v1101_v15 }
 0x1e9   : > { %1261 = vst.msk [vmem:[%s1605_s21 + $0xc8] sm:$0xff] %vm356_vm1, %v961_v50  ;;  %v966_v56 = vadd.f32 %v1598_v1, %v951_v51  ;;  %v949_v57 = vmul.f32 %v1592_v63, %v924_v52  ;;  %v935_v58 = vadd.f32 %v1409_v55, %v1587_v61  ;;  %1104 = vst [vmem:[%s1770_s19 + $0xa8] sm:$0xff] (%p1532_p4), %v1103_v16  ;;  %v1115_v22 = vld [vmem:[%s1605_s21 + $0x98] sm:$0xff] (%p1532_p4) }
 0x1ea   : > { %1252 = vst.msk [vmem:[%s1605_s21 + $0xb8] sm:$0xff] %vm356_vm1, %v800_v53  ;;  %v798_v59 = vadd.f32 %v1598_v1, %v783_v54  ;;  %v926_v60 = vpop.f32.mrf.mxu1  ;;  %1106 = vst [vmem:[%s1770_s19 + $0xb0] sm:$0xff] (%p1532_p4), %v1105_v17  ;;  %v1129_v29 = vld [vmem:[%s1605_s21 + $0xd0] sm:$0xff] (%p1532_p4) }
 0x1eb   : > { %1266 = vst.msk [vmem:[%s1605_s21 + $0xf0] sm:$0xff] %vm356_vm1, %v966_v56  ;;  %v964_v62 = vadd.f32 %v1598_v1, %v949_v57  ;;  %v952_v0 = vmul.f32 %v1592_v63, %v935_v58  ;;  %v927_v2 = vadd.f32 %v1587_v61, %v926_v60  ;;  %v1077_v61 = vld [vmem:[%s1605_s21] sm:$0xff] (%p1532_p4)  ;;  %v1111_v20 = vld [vmem:[%s1605_s21 + $0x88] sm:$0xff] (%p1532_p4)  ;;  %1108 = vst [vmem:[%s1770_s19 + $0xb8] sm:$0xff] (%p1532_p4), %v1107_v18 }
 0x1ec   : > { %1250 = vst.msk [vmem:[%s1605_s21 + $0xa8] sm:$0xff] %vm356_vm1, %v798_v59  ;;  %1078 = vst [vmem:[%s1770_s19] sm:$0xff] (%p1532_p4), %v1077_v61  ;;  %v1125_v27 = vld [vmem:[%s1605_s21 + $0xc0] sm:$0xff] (%p1532_p4) }
 0x1ed   : > { %1264 = vst.msk [vmem:[%s1605_s21 + $0xe0] sm:$0xff] %vm356_vm1, %v964_v62  ;;  %v967_v3 = vadd.f32 %v1598_v1, %v952_v0  ;;  %v950_v4 = vmul.f32 %v1592_v63, %v927_v2  ;;  %983 = sbr.rel (!%p1532_p4) target bundleno = 506 (0x1fa), region = 48  ;;  %v1079_v63 = vld [vmem:[%s1605_s21 + $0x8] sm:$0xff] (%p1532_p4)  ;;  %1110 = vst [vmem:[%s1770_s19 + $0x100] sm:$0xff] (%p1532_p4), %v1109_v19  ;;  %v1121_v25 = vld [vmem:[%s1605_s21 + $0xb0] sm:$0xff] (%p1532_p4) }
 0x1ee   : > { %1080 = vst [vmem:[%s1770_s19 + $0x8] sm:$0xff] (%p1532_p4), %v1079_v63  ;;  %1112 = vst [vmem:[%s1770_s19 + $0x108] sm:$0xff] (%p1532_p4), %v1111_v20  ;;  %v1131_v30 = vld [vmem:[%s1605_s21 + $0xd8] sm:$0xff] (%p1532_p4) }
 0x1ef   : > { %1267 = vst.msk [vmem:[%s1605_s21 + $0xf8] sm:$0xff] %vm356_vm1, %v967_v3  ;;  %v965_v5 = vadd.f32 %v1598_v1, %v950_v4  ;;  %v1083_v1 = vld [vmem:[%s1605_s21 + $0x18] sm:$0xff] (%p1532_p4)  ;;  %v1117_v23 = vld [vmem:[%s1605_s21 + $0xa0] sm:$0xff] (%p1532_p4)  ;;  %1114 = vst [vmem:[%s1770_s19 + $0x110] sm:$0xff] (%p1532_p4), %v1113_v21 }
 0x1f0   : > { %1084 = vst [vmem:[%s1770_s19 + $0x18] sm:$0xff] (%p1532_p4), %v1083_v1  ;;  %1116 = vst [vmem:[%s1770_s19 + $0x118] sm:$0xff] (%p1532_p4), %v1115_v22  ;;  %v1127_v28 = vld [vmem:[%s1605_s21 + $0xc8] sm:$0xff] (%p1532_p4) }
 0x1f1   : > { %1265 = vst.msk [vmem:[%s1605_s21 + $0xe8] sm:$0xff] %vm356_vm1, %v965_v5  ;;  %1118 = vst [vmem:[%s1770_s19 + $0x120] sm:$0xff] (%p1532_p4), %v1117_v23  ;;  %v1123_v26 = vld [vmem:[%s1605_s21 + $0xb8] sm:$0xff] (%p1532_p4) }
 0x1f2   : > { %1122 = vst [vmem:[%s1770_s19 + $0x130] sm:$0xff] %v1121_v25  ;;  %1124 = vst [vmem:[%s1770_s19 + $0x138] sm:$0xff] %v1123_v26  ;;  %v1137_v33 = vld [vmem:[%s1605_s21 + $0xf0] sm:$0xff] }
 0x1f3   : > { %v1119_v24 = vld [vmem:[%s1605_s21 + $0xa8] sm:$0xff]  ;;  %1126 = vst [vmem:[%s1770_s19 + $0x180] sm:$0xff] %v1125_v27  ;;  %1128 = vst [vmem:[%s1770_s19 + $0x188] sm:$0xff] %v1127_v28 }
 0x1f4   : > { %1120 = vst [vmem:[%s1770_s19 + $0x128] sm:$0xff] %v1119_v24  ;;  %1130 = vst [vmem:[%s1770_s19 + $0x190] sm:$0xff] %v1129_v29  ;;  %v1133_v31 = vld [vmem:[%s1605_s21 + $0xe0] sm:$0xff] }
 0x1f5   : > { %1132 = vst [vmem:[%s1770_s19 + $0x198] sm:$0xff] %v1131_v30  ;;  %1134 = vst [vmem:[%s1770_s19 + $0x1a0] sm:$0xff] %v1133_v31 }
 0x1f6   : > { %v1139_v34 = vld [vmem:[%s1605_s21 + $0xf8] sm:$0xff]  ;;  %1138 = vst [vmem:[%s1770_s19 + $0x1b0] sm:$0xff] %v1137_v33 }
 0x1f7   : > { %1140 = vst [vmem:[%s1770_s19 + $0x1b8] sm:$0xff] %v1139_v34 }
 0x1f8   : > { %v1135_v32 = vld [vmem:[%s1605_s21 + $0xe8] sm:$0xff] }
 0x1f9   : > { %1136 = vst [vmem:[%s1770_s19 + $0x1a8] sm:$0xff] %v1135_v32 }
 0x1fa PF: > { %p13_p8 = scmp.ge.s32.totalorder %s1522_s25, 4   ;;  %s1851_s21 = smov %s1462_s22 }
 0x1fb   : > { %s1852_s22 = smov %s1530_s28  ;;  %s1853_s23 = smov %s1522_s25 }
 0x1fc   :  { %15 = sbr.rel (!%p13_p8) target bundleno = 2 (0x2), region = 118 }

// kernel: attention_block_forward.2
= control target key start
LH: loop header
LB: loop body
LE: loop exit
PB: predicated region body
PF: predicated region fallthrough
CT: control target
= control target key end

     0   :  { %s1812_s19 = smov 0   ;;  %s2038_s0 = inlined_call_operand.vmem [shape: bf16[128,4], index: 0, kind: input, shape index: {}]   ;;  %s2039_s1 = inlined_call_operand.vmem [shape: bf16[128,32], index: 1, kind: input, shape index: {}]   ;;  %s2040_s2 = inlined_call_operand.vmem [shape: bf16[4,4], index: 2, kind: input, shape index: {}]   ;;  %s2041_s3 = inlined_call_operand.vmem [shape: f32[1,4], index: 3, kind: input, shape index: {}]   ;;  %s2042_s4 = inlined_call_operand.vmem [shape: bf16[32,4], index: 4, kind: input, shape index: {}]   ;;  %s2043_s5 = inlined_call_operand.vmem [shape: f32[1,4], index: 5, kind: input, shape index: {}]   ;;  %s2044_s6 = inlined_call_operand.<no memory space> [shape: f32[1,1], index: 6, kind: input, shape index: {}]   ;;  %s2045_s7 = inlined_call_operand.vmem [shape: bf16[8,8], index: 7, kind: input, shape index: {}]   ;;  %s2046_s8 = inlined_call_operand.vmem [shape: f32[1,8], index: 8, kind: input, shape index: {}]   ;;  %s2047_s9 = inlined_call_operand.vmem [shape: f32[128,1], index: 9, kind: output, shape index: {0}]   ;;  %s2048_s10 = inlined_call_operand.vmem [shape: f32[2,1,8], index: 10, kind: output, shape index: {1}]   ;;  %s2049_s11 = inlined_call_operand.vmem [shape: f32[2,1,8], index: 11, kind: output, shape index: {2}]  }
   0x1   :  { %v17_v0 = vstv %s2044_s6 }
   0x2   :  { %18 = vst [vmem:[#allocation2] sm:$0x1] %v17_v0 }
   0x3 LB: > { %s1818_s20 = sadd.s32 4294967295, %s1743_s19   ;;  %p1533_p0 = scmp.ge.s32.totalorder %s1743_s19, 1  ;;  %s1743_s19 = sphi %s1812_s19, %s24_s19  }
   0x4   : > { %p356_p1 = scmp.lt.s32.totalorder %s1743_s19, 3 }
   0x6   : > { %p357_p2 = pnand %p1533_p0, %p356_p1 }
   0x7   : > { %s1534_s26 = sshll.u32 (!%p357_p2), %s1818_s20, 3  ;;  %s1748_s28 = smov (!%p357_p2), 104  }
   0x8   : > { %360 = sbr.rel (%p357_p2) target bundleno = 899 (0x383), region = 56  ;;  %p408_p3 = scmp.lt.s32.totalorder (!%p357_p2), %s1534_s26, 15 }
   0x9   : > { %p425_p4 = scmp.lt.s32.totalorder (!%p357_p2), %s1818_s20, 1 }
   0xd   : > { %v1711_v1 = vld [vmem:[%s2042_s4 + $0x8] sm:$0xff]   ;;  %vm481_vm0 = vcmask 1041408   ;;  %v440_v2 = vld [vmem:[%s2040_s2] sm:$0x3]  ;;  %s2051_s26 = smov (!%p408_p3, %s1534_s26), 15  ;;  %vm468_vm1 = vcmask 31744  }
   0xe   : > { %1640 = vmatprep.subr.bf16.mxu1 %v1711_v1  ;;  %1692 = vmatprep.subr.msk.bf16.mxu0 %vm481_vm0, %v440_v2  ;;  %v1712_v3 = vld [vmem:[%s2042_s4] sm:$0xff]   ;;  %v483_v4 = vsel %vm481_vm0, %v440_v2, 0  ;;  %s1535_s27 = sshll.u32 %s2051_s26, 2  ;;  %vm594_vm2 = vcmask 261120   ;;  %s1539_s21 = sshll.u32 %s2051_s26, 3  ;;  %vm774_vm3 = vcmask 7168  }
   0xf   : > { %1641 = vmatpush3.bf16.msra.mxu1 %v1711_v1  ;;  %1631 = vmatpush3.bf16.msra.mxu0 %v483_v4  ;;  %s411_s30 = scalar_lea.vmem %s2038_s0, %s1535_s27  ;;  %s1841_s14 = scalar_lea.vmem %s2039_s1, %s1535_s27  ;;  %v1540_v13 = vld [vmem:[%s2041_s3] ss:$0 sm:$0xff]  ;;  %vm872_vm4 = vcmask 1043456   ;;  %vm859_vm5 = vcmask 64512   ;;  %vm1408_vm6 = vcmask 57344  }
  0x10   : > { %1642 = vmatprep.subr.bf16.mxu1 %v1712_v3  ;;  %v1713_v5 = vld [vmem:[%s411_s30] sm:$0xff]   ;;  %v1715_v7 = vld [vmem:[%s411_s30 + $0x8] sm:$0xff]   ;;  %v1717_v9 = vld [vmem:[%s411_s30 + $0x10] sm:$0xff]   ;;  %s1869_s23 = scalar_lea.vmem %s2047_s9, %s1539_s21  ;;  %s1746_s26 = smov 120  }
  0x11   : > { %v1714_v6 = vld [vmem:[%s1841_s14] sm:$0xff]   ;;  %1632 = vmatprep.mubr.msk.bf16.mxu0 %vm468_vm1, %v1713_v5  ;;  %v1716_v8 = vld [vmem:[%s1841_s14 + $0x8] sm:$0xff]   ;;  %v1718_v10 = vld [vmem:[%s1841_s14 + $0x10] sm:$0xff]   ;;  %s1747_s27 = smov 112   ;;  %s2053_s20 = smov (!%p425_p4, %s1818_s20), 1 }
  0x12   : > { %1644 = vmatprep.mubr.msk.bf16.mxu1 %vm594_vm2, %v1714_v6  ;;  %1633 = vmatmul.mubr.msk.bf16.vlgmr.msra.gmra.mxu0 %vm468_vm1, %v1715_v7  ;;  %v1719_v11 = vld [vmem:[%s411_s30 + $0x18] sm:$0xff]   ;;  %v1559_v22 = vld [vmem:[%s2043_s5] ss:$0 sm:$0xff]  ;;  %v1745_v7 = vmov 0   ;;  %s430_s17 = scalar_lea.vmem %s2049_s11, %s2053_s20 }
  0x13   : > { %1643 = vmatpush3.bf16.msra.mxu1 %v1712_v3  ;;  %1636 = vmatprep.mubr.msk.bf16.mxu0 %vm468_vm1, %v1717_v9  ;;  %v1720_v12 = vld [vmem:[%s1841_s14 + $0x18] sm:$0xff]  }
  0x14   : > { %1710 = vset.pattern.permute.xlu1 %v1745_v7  ;;  %1709 = vset.pattern.permute.xlu0 %v1745_v7 }
  0x16   : > { %1645 = vmatmul.mubr.msk.bf16.vlgmr.msra.gmra.mxu1 %vm594_vm2, %v1716_v8  ;;  %v1560_v8 = vld [vmem:[#allocation2] ss:$0 sm:$0xff] }
  0x17   : > { %1648 = vmatprep.mubr.msk.bf16.mxu1 %vm594_vm2, %v1718_v10 }
  0x1a   : > { %1637 = vmatmul.mubr.msk.bf16.gmra.mxu0 %vm468_vm1, %v1719_v11 }
  0x1e   : > { %1649 = vmatmul.mubr.msk.bf16.gmra.mxu1 %vm594_vm2, %v1720_v12 }
  0xd2   : > { %v1634_v14 = vpop.f32.mrf.mxu0 }
  0xd3   : > { %v528_v15 = vadd.f32 %v1634_v14, %v1540_v13 }
  0xd4   : > { %v519_v17 = vpop.f32.mrf.mxu0 }
  0xd5   : > { %v520_v19 = vadd.f32 %v1540_v13, %v519_v17 }
  0xd6   : > { %v1646_v16 = vpop.f32.mrf.mxu1  ;;  %v1635_v21 = vpop.f32.mrf.mxu0 }
  0xd7   : > { %v674_v18 = vadd.f32 %v1646_v16, %v528_v15  ;;  %v531_v25 = vadd.f32 %v1635_v21, %v1540_v13 }
  0xd8   : > { %v641_v20 = vpop.f32.mrf.mxu1  ;;  %v522_v27 = vpop.f32.mrf.mxu0 }
  0xd9   : > { %v682_v23 = vmax.f32 %v674_v18, 0.0  ;;  %v672_v24 = vadd.f32 %v641_v20, %v520_v19  ;;  %v523_v30 = vadd.f32 %v1540_v13, %v522_v27 }
  0xda   : > { %v1647_v26 = vpop.f32.mrf.mxu1  ;;  %v1638_v33 = vpop.f32.mrf.mxu0 }
  0xdb   : > { %v680_v28 = vmax.f32 %v672_v24, 0.0  ;;  %v675_v29 = vadd.f32 %v1647_v26, %v531_v25  ;;  %v697_v32 = vmul.f32 %v1559_v22, %v682_v23  ;;  %v544_v36 = vadd.f32 %v1638_v33, %v1540_v13 }
  0xdc   : > { %v644_v31 = vpop.f32.mrf.mxu1  ;;  %v535_v39 = vpop.f32.mrf.mxu0 }
  0xdd   : > { %v683_v34 = vmax.f32 %v675_v29, 0.0  ;;  %v673_v35 = vadd.f32 %v644_v31, %v523_v30  ;;  %v709_v38 = vsel %vm468_vm1, %v697_v32, 0.0  ;;  %v695_v40 = vmul.f32 %v1559_v22, %v680_v28 }
  0xde   : > { %v1650_v37 = vpop.f32.mrf.mxu1  ;;  %710 = vadd.xlane.f32.xlu1 %v709_v38  ;;  %v536_v43 = vadd.f32 %v1540_v13, %v535_v39  ;;  %v1639_v46 = vpop.f32.mrf.mxu0 }
  0xdf   : > { %v681_v41 = vmax.f32 %v673_v35, 0.0  ;;  %v698_v44 = vmul.f32 %v1559_v22, %v683_v34  ;;  %v678_v45 = vadd.f32 %v1650_v37, %v544_v36  ;;  %v703_v47 = vsel %vm468_vm1, %v695_v40, 0.0 }
  0xe0   : > { %v657_v42 = vpop.f32.mrf.mxu1  ;;  %v547_v49 = vadd.f32 %v1639_v46, %v1540_v13  ;;  %704 = vadd.xlane.f32.xlu0 %v703_v47  ;;  %v538_v52 = vpop.f32.mrf.mxu0 }
  0xe1   : > { %v676_v48 = vadd.f32 %v657_v42, %v536_v43  ;;  %v712_v51 = vsel %vm468_vm1, %v698_v44, 0.0  ;;  %v696_v53 = vmul.f32 %v1559_v22, %v681_v41  ;;  %v539_v56 = vadd.f32 %v1540_v13, %v538_v52 }
  0xe2   : > { %v1651_v50 = vpop.f32.mrf.mxu1  ;;  %713 = vadd.xlane.f32.xlu1 %v712_v51  ;;  %v686_v57 = vmax.f32 %v678_v45, 0.0  ;;  %v851_v45 = vld [vmem:[%s2045_s7] sm:$0xf] }
  0xe3   : > { %v684_v54 = vmax.f32 %v676_v48, 0.0  ;;  %v679_v55 = vadd.f32 %v1651_v50, %v547_v49  ;;  %v706_v59 = vsel %vm468_vm1, %v696_v53, 0.0  ;;  %1693 = vmatprep.subr.msk.bf16.mxu0 %vm872_vm4, %v851_v45  ;;  %v1880_v47 = vsel %vm872_vm4, %v851_v45, 0  ;;  %1694 = vmatprep.subr.msk.bf16.mxu1 %vm872_vm4, %v851_v45 }
  0xe4   : > { %v660_v58 = vpop.f32.mrf.mxu1  ;;  %707 = vadd.xlane.f32.xlu0 %v706_v59  ;;  %v701_v1 = vmul.f32 %v1559_v22, %v686_v57  ;;  %1653 = vmatpush3.bf16.msra.mxu0 %v1880_v47  ;;  %v1596_v59 = vld [vmem:[%s1841_s14 + $0x8] sm:$0xff]  }
  0xe5   : > { %v677_v60 = vadd.f32 %v660_v58, %v539_v56  ;;  %v699_v61 = vmul.f32 %v1559_v22, %v684_v54  ;;  %v687_v62 = vmax.f32 %v679_v55, 0.0  ;;  %1663 = vmatpush3.bf16.msra.mxu1 %v1880_v47  ;;  %1695 = vmatprep.subr.msk.bf16.mxu0 %vm872_vm4, %v851_v45 }
  0xe6   : > { %v721_v5 = vsel %vm468_vm1, %v701_v1, 0.0  ;;  %1696 = vmatprep.subr.msk.bf16.mxu1 %vm872_vm4, %v851_v45 }
  0xe7   : > { %v685_v63 = vmax.f32 %v677_v60, 0.0  ;;  %v715_v0 = vsel %vm468_vm1, %v699_v61, 0.0  ;;  %v702_v4 = vmul.f32 %v1559_v22, %v687_v62  ;;  %v1586_v61 = vunpack.c.l.bf16 %v1596_v59 }
  0xe8   : > { %716 = vadd.xlane.f32.xlu0 %v715_v0  ;;  %v1587_v62 = vunpack.c.h.bf16 %v1596_v59 }
  0xe9   : > { %v700_v2 = vmul.f32 %v1559_v22, %v685_v63  ;;  %v724_v6 = vsel %vm468_vm1, %v702_v4, 0.0  ;;  %v1581_v63 = vld [vmem:[%s1841_s14] sm:$0xff]  }
  0xea   : > { %v1583_v4 = vunpack.c.h.bf16 %v1581_v63 }
  0xeb   : > { %v718_v3 = vsel %vm468_vm1, %v700_v2, 0.0  ;;  %v1582_v2 = vunpack.c.l.bf16 %v1581_v63 }
  0xec   : > { %719 = vadd.xlane.f32.xlu1 %v718_v3  ;;  %722 = vadd.xlane.f32.xlu0 %v721_v5 }
  0xf0   : > { %725 = vadd.xlane.f32.xlu1 %v724_v6 }
 0x167   : > { %v711_v9 = vpop.xlane.xlu1 %710 }
 0x168   : > { %v736_v10 = vadd.f32 %v1560_v8, %v711_v9 }
 0x169   : > { %v705_v12 = vpop.xlane.xlu0 %704 }
 0x16a   : > { %v744_v11 = vmul.f32 0.5, %v736_v10  ;;  %v734_v13 = vadd.f32 %v1560_v8, %v705_v12  ;;  %v1597_v12 = vld [vmem:[%s1841_s14 + $0x10] sm:$0xff]  }
 0x16b   : > { %v714_v14 = vpop.xlane.xlu1 %713 }
 0x16c   : > { %1721 = vtanh.f32 %v744_v11  ;;  %v737_v15 = vadd.f32 %v1560_v8, %v714_v14  ;;  %v742_v16 = vmul.f32 0.5, %v734_v13  ;;  %v1590_v14 = vunpack.c.l.bf16 %v1597_v12 }
 0x16d   : > { %v708_v18 = vpop.xlane.xlu0 %707 }
 0x16e   : > { %v745_v17 = vmul.f32 0.5, %v737_v15  ;;  %1723 = vtanh.f32 %v742_v16  ;;  %v735_v19 = vadd.f32 %v1560_v8, %v708_v18  ;;  %v1591_v15 = vunpack.c.h.bf16 %v1597_v12  ;;  %v1598_v16 = vld [vmem:[%s1841_s14 + $0x18] sm:$0xff]   ;;  %s427_s14 = scalar_lea.vmem %s2048_s10, %s2053_s20 }
 0x16f   : > { %v1594_v18 = vunpack.c.l.bf16 %v1598_v16 }
 0x170   : > { %1725 = vtanh.f32 %v745_v17  ;;  %v743_v20 = vmul.f32 0.5, %v735_v19 }
 0x171   : > { %v717_v21 = vpop.xlane.xlu0 %716 }
 0x172   : > { %1727 = vtanh.f32 %v743_v20  ;;  %v738_v22 = vadd.f32 %v1560_v8, %v717_v21  ;;  %v1595_v21 = vunpack.c.h.bf16 %v1598_v16 }
 0x174   : > { %v746_v23 = vmul.f32 0.5, %v738_v22 }
 0x175   : > { %v720_v24 = vpop.xlane.xlu1 %719  ;;  %v723_v26 = vpop.xlane.xlu0 %722 }
 0x176   : > { %v739_v25 = vadd.f32 %v1560_v8, %v720_v24  ;;  %1729 = vtanh.f32 %v746_v23  ;;  %v740_v27 = vadd.f32 %v1560_v8, %v723_v26 }
 0x178   : > { %v747_v28 = vmul.f32 0.5, %v739_v25  ;;  %v748_v30 = vmul.f32 0.5, %v740_v27 }
 0x179   : > { %v1722_v29 = vpop.eup %1721  ;;  %v726_v31 = vpop.xlane.xlu1 %725 }
 0x17a   : > { %1731 = vtanh.f32 %v747_v28  ;;  %v741_v32 = vadd.f32 %v1560_v8, %v726_v31  ;;  %v760_v33 = vadd.f32 1.0, %v1722_v29 }
 0x17b   : > { %1733 = vtanh.f32 %v748_v30  ;;  %v1724_v34 = vpop.eup %1723 }
 0x17c   : > { %v749_v35 = vmul.f32 0.5, %v741_v32  ;;  %v768_v36 = vmul.f32 0.5, %v760_v33  ;;  %v758_v38 = vadd.f32 1.0, %v1724_v34 }
 0x17d   : > { %v1726_v37 = vpop.eup %1725 }
 0x17e   : > { %1735 = vtanh.f32 %v749_v35  ;;  %777 = vst.msk [vmem:[%s1869_s23 + $0x10] sm:$0xff] %vm774_vm3, %v768_v36  ;;  %811 = vperm.xlu1 %1710, %v768_v36   ;;  %v761_v39 = vadd.f32 1.0, %v1726_v37  ;;  %v766_v40 = vmul.f32 0.5, %v758_v38 }
 0x17f   : > { %v1728_v41 = vpop.eup %1727 }
 0x180   : > { %v769_v42 = vmul.f32 0.5, %v761_v39  ;;  %801 = vperm.xlu0 %1709, %v766_v40   ;;  %775 = vst.msk [vmem:[%s1869_s23] sm:$0xff] %vm774_vm3, %v766_v40  ;;  %v759_v43 = vadd.f32 1.0, %v1728_v41 }
 0x182   : > { %778 = vst.msk [vmem:[%s1869_s23 + $0x18] sm:$0xff] %vm774_vm3, %v769_v42  ;;  %816 = vperm.xlu1 %1710, %v769_v42   ;;  %v767_v44 = vmul.f32 0.5, %v759_v43 }
 0x183   : > { %v1730_v46 = vpop.eup %1729 }
 0x184   : > { %776 = vst.msk [vmem:[%s1869_s23 + $0x8] sm:$0xff] %vm774_vm3, %v767_v44  ;;  %v762_v48 = vadd.f32 1.0, %v1730_v46 }
 0x186   : > { %806 = vperm.xlu1 %1710, %v767_v44   ;;  %v770_v50 = vmul.f32 0.5, %v762_v48  ;;  %v1919_v44 = vld [vmem:[%s2046_s8] ss:$0 sm:$0xff] }
 0x187   : > { %v1732_v49 = vpop.eup %1731 }
 0x188   : > { %v1734_v51 = vpop.eup %1733  ;;  %v763_v52 = vadd.f32 1.0, %v1732_v49  ;;  %779 = vst.msk [vmem:[%s1869_s23 + $0x20] sm:$0xff] %vm774_vm3, %v770_v50 }
 0x189   : > { %v764_v53 = vadd.f32 1.0, %v1734_v51 }
 0x18a   : > { %v771_v54 = vmul.f32 0.5, %v763_v52 }
 0x18b   : > { %v1736_v55 = vpop.eup %1735  ;;  %v772_v56 = vmul.f32 0.5, %v764_v53 }
 0x18c   : > { %780 = vst.msk [vmem:[%s1869_s23 + $0x28] sm:$0xff] %vm774_vm3, %v771_v54  ;;  %v765_v57 = vadd.f32 1.0, %v1736_v55 }
 0x18d   : > { %831 = vperm.xlu1 %1710, %v772_v56   ;;  %781 = vst.msk [vmem:[%s1869_s23 + $0x30] sm:$0xff] %vm774_vm3, %v772_v56 }
 0x18e   : > { %v773_v58 = vmul.f32 0.5, %v765_v57 }
 0x190   : > { %782 = vst.msk [vmem:[%s1869_s23 + $0x38] sm:$0xff] %vm774_vm3, %v773_v58 }
 0x191   : > { %821 = vperm.xlu1 %1710, %v770_v50  }
 0x195   : > { %826 = vperm.xlu1 %1710, %v771_v54  }
 0x199   : > { %836 = vperm.xlu1 %1710, %v773_v58  }
 0x1f9   : > { %v812_v60 = vpop.permute.xlu1 %811 }
 0x1fa   : > { %v841_v1 = vmul.f32 %v1586_v61, %v812_v60 }
 0x1fb   : > { %v802_v5 = vpop.permute.xlu0 %801 }
 0x1fc   : > { %v839_v8 = vmul.f32 %v1582_v2, %v802_v5 }
 0x1fd   : > { %v817_v0 = vpop.permute.xlu1 %816 }
 0x1fe   : > { %v842_v3 = vmul.f32 %v1587_v62, %v817_v0 }
 0x200   : > { %v848_v6 = vpack.c.bf16 %v842_v3, %v841_v1 }
 0x201   : > { %v807_v7 = vpop.permute.xlu1 %806 }
 0x202   : > { %v840_v9 = vmul.f32 %v1583_v4, %v807_v7  ;;  %999 = vrot.lane.b32.xlu0 %v848_v6, %s1746_s26 }
 0x204   : > { %v847_v10 = vpack.c.bf16 %v840_v9, %v839_v8 }
 0x206   : > { %997 = vrot.lane.b32.xlu1 %v847_v10, %s1746_s26  ;;  %1654 = vmatprep.mubr.msk.bf16.mxu0 %vm859_vm5, %v847_v10 }
 0x207   : > { %1655 = vmatmul.mubr.msk.bf16.vlgmr.msra.gmra.mxu0 %vm859_vm5, %v848_v6 }
 0x208   : > { %v832_v11 = vpop.permute.xlu1 %831  ;;  %1673 = vmatpush3.bf16.msra.mxu0 %v1880_v47 }
 0x209   : > { %v845_v24 = vmul.f32 %v1594_v18, %v832_v11 }
 0x20c   : > { %v822_v13 = vpop.permute.xlu1 %821 }
 0x20d   : > { %v843_v19 = vmul.f32 %v1590_v14, %v822_v13 }
 0x210   : > { %v827_v17 = vpop.permute.xlu1 %826 }
 0x211   : > { %v844_v20 = vmul.f32 %v1591_v15, %v827_v17 }
 0x213   : > { %v849_v22 = vpack.c.bf16 %v844_v20, %v843_v19 }
 0x214   : > { %v837_v23 = vpop.permute.xlu1 %836 }
 0x215   : > { %v846_v25 = vmul.f32 %v1595_v21, %v837_v23  ;;  %1001 = vrot.lane.b32.xlu1 %v849_v22, %s1746_s26  ;;  %1658 = vmatprep.mubr.msk.bf16.mxu0 %vm859_vm5, %v849_v22 }
 0x217   : > { %v850_v26 = vpack.c.bf16 %v846_v25, %v845_v24 }
 0x219   : > { %1003 = vrot.lane.b32.xlu0 %v850_v26, %s1746_s26  ;;  %1134 = vrot.lane.b32.xlu1 %v847_v10, %s1747_s27 }
 0x21a   : > { %1659 = vmatmul.mubr.msk.bf16.gmra.mxu0 %vm859_vm5, %v850_v26 }
 0x21d   : > { %1136 = vrot.lane.b32.xlu0 %v848_v6, %s1747_s27  ;;  %1271 = vrot.lane.b32.xlu1 %v847_v10, %s1748_s28 }
 0x221   : > { %1273 = vrot.lane.b32.xlu0 %v848_v6, %s1748_s28  ;;  %1138 = vrot.lane.b32.xlu1 %v849_v22, %s1747_s27 }
 0x225   : > { %1140 = vrot.lane.b32.xlu0 %v850_v26, %s1747_s27  ;;  %1275 = vrot.lane.b32.xlu1 %v849_v22, %s1748_s28 }
 0x229   : > { %1277 = vrot.lane.b32.xlu0 %v850_v26, %s1748_s28 }
 0x274   : > { %v1000_v28 = vpop.permute.xlu0 %999 }
 0x278   : > { %v998_v27 = vpop.permute.xlu1 %997 }
 0x279   : > { %1664 = vmatprep.mubr.msk.bf16.mxu1 %vm859_vm5, %v998_v27 }
 0x27a   : > { %1665 = vmatmul.mubr.msk.bf16.vlgmr.msra.gmra.mxu1 %vm859_vm5, %v1000_v28 }
 0x27b   : > { %1683 = vmatpush3.bf16.msra.mxu1 %v1880_v47 }
 0x287   : > { %v1002_v29 = vpop.permute.xlu1 %1001 }
 0x288   : > { %1668 = vmatprep.mubr.msk.bf16.mxu1 %vm859_vm5, %v1002_v29 }
 0x28b   : > { %v1135_v30 = vpop.permute.xlu1 %1134  ;;  %v1004_v31 = vpop.permute.xlu0 %1003 }
 0x28c   : > { %1669 = vmatmul.mubr.msk.bf16.gmra.mxu1 %vm859_vm5, %v1004_v31  ;;  %1674 = vmatprep.mubr.msk.bf16.mxu0 %vm859_vm5, %v1135_v30 }
 0x28f   : > { %v1272_v32 = vpop.permute.xlu1 %1271  ;;  %v1137_v33 = vpop.permute.xlu0 %1136 }
 0x290   : > { %1675 = vmatmul.mubr.msk.bf16.vlgmr.msra.gmra.mxu0 %vm859_vm5, %v1137_v33  ;;  %1684 = vmatprep.mubr.msk.bf16.mxu1 %vm859_vm5, %v1272_v32 }
 0x293   : > { %v1139_v34 = vpop.permute.xlu1 %1138  ;;  %v1274_v35 = vpop.permute.xlu0 %1273 }
 0x294   : > { %1678 = vmatprep.mubr.msk.bf16.mxu0 %vm859_vm5, %v1139_v34  ;;  %1685 = vmatmul.mubr.msk.bf16.vlgmr.msra.gmra.mxu1 %vm859_vm5, %v1274_v35 }
 0x297   : > { %v1276_v36 = vpop.permute.xlu1 %1275  ;;  %v1141_v37 = vpop.permute.xlu0 %1140 }
 0x298   : > { %1679 = vmatmul.mubr.msk.bf16.gmra.mxu0 %vm859_vm5, %v1141_v37  ;;  %1688 = vmatprep.mubr.msk.bf16.mxu1 %vm859_vm5, %v1276_v36 }
 0x29b   : > { %v1278_v38 = vpop.permute.xlu0 %1277 }
 0x29c   : > { %1689 = vmatmul.mubr.msk.bf16.gmra.mxu1 %vm859_vm5, %v1278_v38 }
 0x2c7   : > { %v1656_v39 = vpop.f32.mrf.mxu0 }
 0x2c8   : > { %v919_v51 = vadd.f32 %v1656_v39, %v1919_v44 }
 0x2c9   : > { %v910_v40 = vpop.f32.mrf.mxu0 }
 0x2ca   : > { %v911_v47 = vadd.f32 %v1919_v44, %v910_v40  ;;  %v944_v58 = vsel %vm859_vm5, %v919_v51, 0.0  ;;  %v965_v59 = vmul.f32 %v919_v51, %v919_v51 }
 0x2cb   : > { %v1657_v41 = vpop.f32.mrf.mxu0 }
 0x2cc   : > { %v941_v52 = vsel %vm859_vm5, %v911_v47, 0.0  ;;  %v963_v53 = vmul.f32 %v911_v47, %v911_v47  ;;  %v922_v60 = vadd.f32 %v1657_v41, %v1919_v44  ;;  %v974_v4 = vsel %vm859_vm5, %v965_v59, 0.0 }
 0x2cd   : > { %v913_v42 = vpop.f32.mrf.mxu0 }
 0x2ce   : > { %v914_v45 = vadd.f32 %v1919_v44, %v913_v42  ;;  %v971_v63 = vsel %vm859_vm5, %v963_v53, 0.0  ;;  %v946_v5 = vsel %vm859_vm5, %v922_v60, 0.0  ;;  %v966_v8 = vmul.f32 %v922_v60, %v922_v60 }
 0x2d0   : > { %v942_v48 = vsel %vm859_vm5, %v914_v45, 0.0  ;;  %v964_v49 = vmul.f32 %v914_v45, %v914_v45  ;;  %v976_v18 = vsel %vm859_vm5, %v966_v8, 0.0 }
 0x2d1   : > { %v943_v54 = vadd.f32 %v942_v48, %v941_v52 }
 0x2d2   : > { %v972_v56 = vsel %vm859_vm5, %v964_v49, 0.0 }
 0x2d3   : > { %v945_v0 = vadd.f32 %v944_v58, %v943_v54  ;;  %v973_v1 = vadd.f32 %v972_v56, %v971_v63 }
 0x2d5   : > { %v947_v9 = vadd.f32 %v946_v5, %v945_v0  ;;  %v975_v12 = vadd.f32 %v974_v4, %v973_v1 }
 0x2d7   : > { %v977_v22 = vadd.f32 %v976_v18, %v975_v12 }
 0x2da   : > { %v1660_v43 = vpop.f32.mrf.mxu0 }
 0x2db   : > { %v935_v17 = vadd.f32 %v1660_v43, %v1919_v44 }
 0x2dc   : > { %v926_v46 = vpop.f32.mrf.mxu0 }
 0x2dd   : > { %v927_v61 = vadd.f32 %v1919_v44, %v926_v46  ;;  %v952_v27 = vsel %vm859_vm5, %v935_v17, 0.0  ;;  %v969_v30 = vmul.f32 %v935_v17, %v935_v17 }
 0x2de   : > { %v1661_v50 = vpop.f32.mrf.mxu0 }
 0x2df   : > { %v948_v6 = vsel %vm859_vm5, %v927_v61, 0.0  ;;  %v967_v10 = vmul.f32 %v927_v61, %v927_v61  ;;  %v938_v29 = vadd.f32 %v1661_v50, %v1919_v44  ;;  %v982_v43 = vsel %vm859_vm5, %v969_v30, 0.0 }
 0x2e0   : > { %v929_v57 = vpop.f32.mrf.mxu0  ;;  %v949_v14 = vadd.f32 %v948_v6, %v947_v9 }
 0x2e1   : > { %v930_v2 = vadd.f32 %v1919_v44, %v929_v57  ;;  %v978_v19 = vsel %vm859_vm5, %v967_v10, 0.0  ;;  %v954_v39 = vsel %vm859_vm5, %v938_v29, 0.0  ;;  %v970_v40 = vmul.f32 %v938_v29, %v938_v29 }
 0x2e2   : > { %v979_v28 = vadd.f32 %v978_v19, %v977_v22 }
 0x2e3   : > { %v950_v13 = vsel %vm859_vm5, %v930_v2, 0.0  ;;  %v968_v15 = vmul.f32 %v930_v2, %v930_v2  ;;  %v984_v54 = vsel %vm859_vm5, %v970_v40, 0.0 }
 0x2e4   : > { %v951_v20 = vadd.f32 %v950_v13, %v949_v14 }
 0x2e5   : > { %v980_v23 = vsel %vm859_vm5, %v968_v15, 0.0 }
 0x2e6   : > { %v953_v31 = vadd.f32 %v952_v27, %v951_v20  ;;  %v981_v34 = vadd.f32 %v980_v23, %v979_v28 }
 0x2e8   : > { %v955_v45 = vadd.f32 %v954_v39, %v953_v31  ;;  %v983_v47 = vadd.f32 %v982_v43, %v981_v34 }
 0x2ea   : > { %v956_v58 = vrot.slane %v955_v45, 4 }
 0x33a   : > { %v1666_v55 = vpop.f32.mrf.mxu1 }
 0x33b   : > { %v1060_v24 = vadd.f32 %v1666_v55, %v1919_v44 }
 0x33c   : > { %v1051_v62 = vpop.f32.mrf.mxu1 }
 0x33d   : > { %v1052_v16 = vadd.f32 %v1919_v44, %v1051_v62  ;;  %v1106_v36 = vmul.f32 %v1060_v24, %v1060_v24  ;;  %v1085_v46 = vsel %vm859_vm5, %v1060_v24, 0.0  ;;  %v985_v62 = vadd.f32 %v984_v54, %v983_v47 }
 0x33e   : > { %v1667_v3 = vpop.f32.mrf.mxu1 }
 0x33f   : > { %v1104_v25 = vmul.f32 %v1052_v16, %v1052_v16  ;;  %v1082_v32 = vsel %vm859_vm5, %v1052_v16, 0.0  ;;  %v1063_v38 = vadd.f32 %v1667_v3, %v1919_v44  ;;  %v1115_v50 = vsel %vm859_vm5, %v1106_v36, 0.0 }
 0x340   : > { %v1054_v7 = vpop.f32.mrf.mxu1  ;;  %v986_v15 = vrot.slane %v985_v62, 4 }
 0x341   : > { %v1055_v11 = vadd.f32 %v1919_v44, %v1054_v7  ;;  %v1112_v37 = vsel %vm859_vm5, %v1104_v25, 0.0  ;;  %v1107_v51 = vmul.f32 %v1063_v38, %v1063_v38  ;;  %v1087_v59 = vsel %vm859_vm5, %v1063_v38, 0.0 }
 0x343   : > { %v1105_v21 = vmul.f32 %v1055_v11, %v1055_v11  ;;  %v1083_v26 = vsel %vm859_vm5, %v1055_v11, 0.0  ;;  %v1117_v2 = vsel %vm859_vm5, %v1107_v51, 0.0  ;;  %v1963_v11 = vadd.f32 %v956_v58, %v955_v45 }
 0x344   : > { %v1084_v35 = vadd.f32 %v1083_v26, %v1082_v32 }
 0x345   : > { %v1113_v33 = vsel %vm859_vm5, %v1105_v21, 0.0 }
 0x346   : > { %v1114_v41 = vadd.f32 %v1113_v33, %v1112_v37  ;;  %v1086_v48 = vadd.f32 %v1085_v46, %v1084_v35 }
 0x348   : > { %v1116_v55 = vadd.f32 %v1115_v50, %v1114_v41  ;;  %v1088_v63 = vadd.f32 %v1087_v59, %v1086_v48 }
 0x34a   : > { %v1118_v7 = vadd.f32 %v1117_v2, %v1116_v55 }
 0x34c   : > { %v1670_v42 = vpop.f32.mrf.mxu1 }
 0x34d   : > { %v1076_v52 = vadd.f32 %v1670_v42, %v1919_v44 }
 0x34e   : > { %v1067_v49 = vpop.f32.mrf.mxu1 }
 0x34f   : > { %v1068_v53 = vadd.f32 %v1919_v44, %v1067_v49  ;;  %v1110_v3 = vmul.f32 %v1076_v52, %v1076_v52  ;;  %v1093_v16 = vsel %vm859_vm5, %v1076_v52, 0.0 }
 0x350   : > { %v1671_v56 = vpop.f32.mrf.mxu1  ;;  %v1676_v57 = vpop.f32.mrf.mxu0 }
 0x351   : > { %v1089_v60 = vsel %vm859_vm5, %v1068_v53, 0.0  ;;  %v1108_v61 = vmul.f32 %v1068_v53, %v1068_v53  ;;  %v1079_v12 = vadd.f32 %v1671_v56, %v1919_v44  ;;  %v1123_v21 = vsel %vm859_vm5, %v1110_v3, 0.0 }
 0x352   : > { %v1070_v0 = vpop.f32.mrf.mxu1  ;;  %v1188_v1 = vpop.f32.mrf.mxu0  ;;  %v1090_v6 = vadd.f32 %v1089_v60, %v1088_v63  ;;  %v1197_v22 = vadd.f32 %v1676_v57, %v1919_v44  ;;  %v958_v56 = vrot.slane %v1963_v11, 2  ;;  %v1985_v60 = vadd.f32 %v986_v15, %v985_v62 }
 0x353   : > { %v1119_v4 = vsel %vm859_vm5, %v1108_v61, 0.0  ;;  %v1071_v5 = vadd.f32 %v1919_v44, %v1070_v0  ;;  %v1189_v8 = vadd.f32 %v1919_v44, %v1188_v1  ;;  %v1095_v31 = vsel %vm859_vm5, %v1079_v12, 0.0 }
 0x354   : > { %v1677_v9 = vpop.f32.mrf.mxu0  ;;  %v1686_v10 = vpop.f32.mrf.mxu1  ;;  %v1120_v17 = vadd.f32 %v1119_v4, %v1118_v7  ;;  %v1111_v32 = vmul.f32 %v1079_v12, %v1079_v12  ;;  %v1222_v41 = vsel %vm859_vm5, %v1197_v22, 0.0  ;;  %v1243_v42 = vmul.f32 %v1197_v22, %v1197_v22 }
 0x355   : > { %v1091_v13 = vsel %vm859_vm5, %v1071_v5, 0.0  ;;  %v1109_v14 = vmul.f32 %v1071_v5, %v1071_v5  ;;  %v1200_v24 = vadd.f32 %v1677_v9, %v1919_v44  ;;  %v1241_v27 = vmul.f32 %v1189_v8, %v1189_v8 }
 0x356   : > { %v1092_v18 = vadd.f32 %v1091_v13, %v1090_v6  ;;  %v1191_v19 = vpop.f32.mrf.mxu0  ;;  %v1325_v20 = vpop.f32.mrf.mxu1  ;;  %v1219_v33 = vsel %vm859_vm5, %v1189_v8, 0.0  ;;  %v1334_v34 = vadd.f32 %v1686_v10, %v1919_v44  ;;  %v1125_v52 = vsel %vm859_vm5, %v1111_v32, 0.0 }
 0x357   : > { %v1121_v23 = vsel %vm859_vm5, %v1109_v14, 0.0  ;;  %v1192_v28 = vadd.f32 %v1919_v44, %v1191_v19  ;;  %v1326_v45 = vadd.f32 %v1919_v44, %v1325_v20  ;;  %v1249_v47 = vsel %vm859_vm5, %v1241_v27, 0.0 }
 0x358   : > { %v1094_v25 = vadd.f32 %v1093_v16, %v1092_v18  ;;  %v1122_v26 = vadd.f32 %v1121_v23, %v1120_v17  ;;  %v1680_v29 = vpop.f32.mrf.mxu0  ;;  %v1687_v30 = vpop.f32.mrf.mxu1  ;;  %v1244_v48 = vmul.f32 %v1200_v24, %v1200_v24  ;;  %v1380_v53 = vmul.f32 %v1334_v34, %v1334_v34 }
 0x359   : > { %v1220_v37 = vsel %vm859_vm5, %v1192_v28, 0.0  ;;  %v1242_v38 = vmul.f32 %v1192_v28, %v1192_v28  ;;  %v1213_v58 = vadd.f32 %v1680_v29, %v1919_v44  ;;  %v1337_v59 = vadd.f32 %v1687_v30, %v1919_v44 }
 0x35a   : > { %v1096_v35 = vadd.f32 %v1095_v31, %v1094_v25  ;;  %v1124_v36 = vadd.f32 %v1123_v21, %v1122_v26  ;;  %v1204_v39 = vpop.f32.mrf.mxu0  ;;  %v1328_v40 = vpop.f32.mrf.mxu1  ;;  %v1221_v43 = vadd.f32 %v1220_v37, %v1219_v33  ;;  %v1252_v61 = vsel %vm859_vm5, %v1243_v42, 0.0 }
 0x35b   : > { %v1250_v49 = vsel %vm859_vm5, %v1242_v38, 0.0  ;;  %v1378_v63 = vmul.f32 %v1326_v45, %v1326_v45  ;;  %v1205_v0 = vadd.f32 %v1919_v44, %v1204_v39  ;;  %v1224_v3 = vsel %vm859_vm5, %v1200_v24, 0.0 }
 0x35c   : > { %v1097_v46 = vrot.slane %v1096_v35, 4  ;;  %v1681_v50 = vpop.f32.mrf.mxu0  ;;  %v1690_v51 = vpop.f32.mrf.mxu1  ;;  %v1223_v54 = vadd.f32 %v1222_v41, %v1221_v43  ;;  %v1251_v55 = vadd.f32 %v1250_v49, %v1249_v47  ;;  %v1126_v57 = vadd.f32 %v1125_v52, %v1124_v36 }
 0x35d   : > { %v1254_v4 = vsel %vm859_vm5, %v1244_v48, 0.0  ;;  %v1359_v7 = vsel %vm859_vm5, %v1334_v34, 0.0  ;;  %v1389_v8 = vsel %vm859_vm5, %v1380_v53, 0.0  ;;  %v1356_v62 = vsel %vm859_vm5, %v1326_v45, 0.0 }
 0x35e   : > { %v1341_v1 = vpop.f32.mrf.mxu1  ;;  %v1098_v2 = vadd.f32 %v1097_v46, %v1096_v35  ;;  %v1253_v5 = vadd.f32 %v1252_v61, %v1251_v55  ;;  %v1207_v6 = vpop.f32.mrf.mxu0  ;;  %v1225_v9 = vadd.f32 %v1224_v3, %v1223_v54  ;;  %v1127_v10 = vrot.slane %v1126_v57, 4 }
 0x35f   : > { %v1247_v12 = vmul.f32 %v1213_v58, %v1213_v58  ;;  %v1381_v13 = vmul.f32 %v1337_v59, %v1337_v59  ;;  %v1329_v14 = vadd.f32 %v1919_v44, %v1328_v40  ;;  %v1386_v15 = vsel %vm859_vm5, %v1378_v63, 0.0 }
 0x360   : > { %v1230_v16 = vsel %vm859_vm5, %v1213_v58, 0.0  ;;  %v1245_v17 = vmul.f32 %v1205_v0, %v1205_v0  ;;  %v1208_v18 = vadd.f32 %v1919_v44, %v1207_v6  ;;  %v1691_v19 = vpop.f32.mrf.mxu1  ;;  %v1099_v20 = vrot.slane %v1098_v2, 2 }
 0x361   : > { %v1226_v21 = vsel %vm859_vm5, %v1205_v0, 0.0  ;;  %v1255_v22 = vadd.f32 %v1254_v4, %v1253_v5  ;;  %v1357_v23 = vsel %vm859_vm5, %v1329_v14, 0.0  ;;  %v1361_v24 = vsel %vm859_vm5, %v1337_v59, 0.0 }
 0x362   : > { %v1227_v25 = vadd.f32 %v1226_v21, %v1225_v9  ;;  %v1358_v26 = vadd.f32 %v1357_v23, %v1356_v62  ;;  %v1379_v27 = vmul.f32 %v1329_v14, %v1329_v14  ;;  %v1128_v28 = vadd.f32 %v1127_v10, %v1126_v57  ;;  %v1344_v36 = vpop.f32.mrf.mxu1 }
 0x363   : > { %v1260_v29 = vsel %vm859_vm5, %v1247_v12, 0.0  ;;  %v1391_v30 = vsel %vm859_vm5, %v1381_v13, 0.0  ;;  %v1216_v31 = vadd.f32 %v1681_v50, %v1919_v44  ;;  %v1256_v32 = vsel %vm859_vm5, %v1245_v17, 0.0 }
 0x364   : > { %v1360_v33 = vadd.f32 %v1359_v7, %v1358_v26  ;;  %v1387_v34 = vsel %vm859_vm5, %v1379_v27, 0.0  ;;  %v1228_v35 = vsel %vm859_vm5, %v1208_v18, 0.0  ;;  %v1100_v37 = vadd.f32 %v1099_v20, %v1098_v2 }
 0x365   : > { %v1257_v38 = vadd.f32 %v1256_v32, %v1255_v22  ;;  %v1388_v39 = vadd.f32 %v1387_v34, %v1386_v15  ;;  %v1350_v40 = vadd.f32 %v1690_v51, %v1919_v44  ;;  %v1229_v41 = vadd.f32 %v1228_v35, %v1227_v25 }
 0x366   : > { %v1246_v42 = vmul.f32 %v1208_v18, %v1208_v18  ;;  %v1342_v43 = vadd.f32 %v1919_v44, %v1341_v1  ;;  %v1362_v45 = vadd.f32 %v1361_v24, %v1360_v33  ;;  %v1232_v47 = vsel %vm859_vm5, %v1216_v31, 0.0 }
 0x367   : > { %v1390_v46 = vadd.f32 %v1389_v8, %v1388_v39  ;;  %v1248_v48 = vmul.f32 %v1216_v31, %v1216_v31  ;;  %v1345_v49 = vadd.f32 %v1919_v44, %v1344_v36  ;;  %v1231_v50 = vadd.f32 %v1230_v16, %v1229_v41 }
 0x368   : > { %v1258_v52 = vsel %vm859_vm5, %v1246_v42, 0.0  ;;  %v1363_v53 = vsel %vm859_vm5, %v1342_v43, 0.0  ;;  %v1382_v54 = vmul.f32 %v1342_v43, %v1342_v43  ;;  %v1353_v58 = vadd.f32 %v1691_v19, %v1919_v44 }
 0x369   : > { %v1259_v55 = vadd.f32 %v1258_v52, %v1257_v38  ;;  %v1364_v57 = vadd.f32 %v1363_v53, %v1362_v45  ;;  %v1392_v51 = vadd.f32 %v1391_v30, %v1390_v46  ;;  %v1384_v59 = vmul.f32 %v1350_v40, %v1350_v40 }
 0x36a   : > { %v1233_v61 = vadd.f32 %v1232_v47, %v1231_v50  ;;  %v1393_v63 = vsel %vm859_vm5, %v1382_v54, 0.0  ;;  %v1365_v0 = vsel %vm859_vm5, %v1345_v49, 0.0  ;;  %v1383_v4 = vmul.f32 %v1345_v49, %v1345_v49 }
 0x36b   : > { %v1261_v1 = vadd.f32 %v1260_v29, %v1259_v55  ;;  %v1394_v2 = vadd.f32 %v1393_v63, %v1392_v51  ;;  %v1366_v3 = vadd.f32 %v1365_v0, %v1364_v57  ;;  %v1129_v5 = vrot.slane %v1128_v28, 2 }
 0x36c   : > { %v1262_v6 = vsel %vm859_vm5, %v1248_v48, 0.0  ;;  %v1367_v7 = vsel %vm859_vm5, %v1350_v40, 0.0  ;;  %v1234_v8 = vrot.slane %v1233_v61, 4  ;;  %v1385_v9 = vmul.f32 %v1353_v58, %v1353_v58 }
 0x36d   : > { %v1263_v62 = vadd.f32 %v1262_v6, %v1261_v1  ;;  %v1368_v10 = vadd.f32 %v1367_v7, %v1366_v3  ;;  %v1395_v44 = vsel %vm859_vm5, %v1383_v4, 0.0  ;;  %v988_v12 = vrot.slane %v1985_v60, 2 }
 0x36e   : > { %v1235_v13 = vadd.f32 %v1234_v8, %v1233_v61  ;;  %v1369_v14 = vsel %vm859_vm5, %v1353_v58, 0.0  ;;  %v1396_v15 = vadd.f32 %v1395_v44, %v1394_v2  ;;  %v959_v16 = vadd.f32 %v958_v56, %v1963_v11 }
 0x36f   : > { %v1397_v17 = vsel %vm859_vm5, %v1384_v59, 0.0  ;;  %v1264_v18 = vrot.slane %v1263_v62, 4  ;;  %v1370_v19 = vadd.f32 %v1369_v14, %v1368_v10  ;;  %v1130_v20 = vadd.f32 %v1129_v5, %v1128_v28 }
 0x370   : > { %v1236_v21 = vrot.slane %v1235_v13, 2  ;;  %v1398_v22 = vadd.f32 %v1397_v17, %v1396_v15  ;;  %v1101_v23 = vrot.slane %v1100_v37, 1  ;;  %v1399_v25 = vsel %vm859_vm5, %v1385_v9, 0.0 }
 0x371   : > { %v1265_v24 = vadd.f32 %v1264_v18, %v1263_v62  ;;  %v1371_v26 = vrot.slane %v1370_v19, 4  ;;  %v989_v27 = vadd.f32 %v988_v12, %v1985_v60  ;;  %v960_v31 = vrot.slane %v959_v16, 1 }
 0x372   : > { %v1237_v29 = vadd.f32 %v1236_v21, %v1235_v13  ;;  %v1400_v30 = vadd.f32 %v1399_v25, %v1398_v22  ;;  %v1131_v56 = vrot.slane %v1130_v20, 1  ;;  %v1102_v28 = vadd.f32 %v1101_v23, %v1100_v37 }
 0x373   : > { %v1266_v32 = vrot.slane %v1265_v24, 2  ;;  %v1372_v11 = vadd.f32 %v1371_v26, %v1370_v19  ;;  %v990_v38 = vrot.slane %v989_v27, 1  ;;  %v961_v40 = vadd.f32 %v960_v31, %v959_v16 }
 0x374   : > { %v1238_v33 = vrot.slane %v1237_v29, 1  ;;  %v1401_v34 = vrot.slane %v1400_v30, 4  ;;  %v1132_v60 = vadd.f32 %v1131_v56, %v1130_v20 }
 0x375   : > { %v1267_v35 = vadd.f32 %v1266_v32, %v1265_v24  ;;  %v1373_v36 = vrot.slane %v1372_v11, 2  ;;  %v1103_v46 = vadd.f32 %v1102_v28, %v961_v40  ;;  %v991_v48 = vadd.f32 %v990_v38, %v989_v27 }
 0x376   : > { %v1402_v39 = vadd.f32 %v1401_v34, %v1400_v30  ;;  %v1239_v41 = vadd.f32 %v1238_v33, %v1237_v29 }
 0x377   : > { %v1268_v42 = vrot.slane %v1267_v35, 1  ;;  %v1374_v43 = vadd.f32 %v1373_v36, %v1372_v11  ;;  %v1133_v54 = vadd.f32 %v1132_v60, %v991_v48 }
 0x378   : > { %v1403_v45 = vrot.slane %v1402_v39, 2  ;;  %v1240_v52 = vadd.f32 %v1239_v41, %v1103_v46 }
 0x379   : > { %v1375_v47 = vrot.slane %v1374_v43, 1  ;;  %v1269_v49 = vadd.f32 %v1268_v42, %v1267_v35 }
 0x37a   : > { %v1404_v50 = vadd.f32 %v1403_v45, %v1402_v39 }
 0x37b   : > { %v1376_v53 = vadd.f32 %v1375_v47, %v1374_v43  ;;  %v1270_v57 = vadd.f32 %v1269_v49, %v1133_v54 }
 0x37c   : > { %v1405_v37 = vrot.slane %v1404_v50, 1 }
 0x37d   : > { %v1377_v55 = vadd.f32 %v1376_v53, %v1240_v52 }
 0x37e   : > { %v1406_v51 = vadd.f32 %v1405_v37, %v1404_v50 }
 0x37f   : > { %1409 = vst.msk [vmem:[%s427_s14] sm:$0x1] %vm1408_vm6, %v1377_v55 }
 0x380   : > { %v1407_v58 = vadd.f32 %v1406_v51, %v1270_v57 }
 0x382   : > { %1410 = vst.msk [vmem:[%s430_s17] sm:$0x1] %vm1408_vm6, %v1407_v58 }
 0x383 PF: > { %s24_s19 = sadd.s32 1, %s1743_s19  }
 0x384   : > { %p21_p5 = scmp.ge.s32.totalorder %s24_s19, 4  }
 0x386   :  { %23 = sbr.rel (!%p21_p5) target bundleno = 3 (0x3), region = 113 }

</bundles_post_ra>
